<compile_context>
chip_gen: v5e
topology: v5e:2x2
jax: 0.10.0
libtpu: 0.0.40
codegen_flags: <defaults>
</compile_context>

<pallas_src>
import functools

import jax
import jax.numpy as jnp
from jax.experimental import pallas as pl
from jax.experimental.pallas import tpu as pltpu


# ------------------- Kernel 1: QKV projection + QKNorm + RoPE -------------------


def _qkv_rope_kernel(
    x_ref,       # (TL, dim)     f32 activations for this (batch, seq) tile
    wqkv_ref,    # (dim, 3*dim)  bf16 == W_qkv^T (q/k head_dim de-interleaved)
    bqkv_ref,    # (1, 3*dim)    f32
    qw_ref,      # (1, D)        f32 RMS weight for q (permuted, * 1/sqrt(D))
    kw_ref,      # (1, D)        f32 RMS weight for k (permuted)
    cos_ref,     # (TL, D)       f32 [ cos | cos ]
    sin_ref,     # (TL, D)       f32 [-sin | sin ]
    q_out_ref,   # (TL, dim)     bf16 rotated (and pre-scaled) q
    k_out_ref,   # (TL, dim)     bf16 rotated k
    v_out_ref,   # (TL, dim)     bf16 v
    *,
    num_heads: int,
):
    H = num_heads
    dim = x_ref.shape[-1]
    D = dim // H
    D2 = D // 2
    eps = jnp.float32(jnp.finfo(jnp.float32).eps)

    # QKV projection: bf16 MXU operands, f32 accumulation.
    x = x_ref[...].astype(wqkv_ref.dtype)
    qkv = (
        jnp.dot(x, wqkv_ref[...], preferred_element_type=jnp.float32)
        + bqkv_ref[...]
    )  # (TL, 3*dim) f32

    cos_f = cos_ref[...]
    sin_s = sin_ref[...]
    qw = qw_ref[...]
    kw = kw_ref[...]

    for h in range(H):  # static unroll; per-head live ranges stay bounded
        sl = slice(h * D, (h + 1) * D)
        qh = qkv[:, h * D:(h + 1) * D]
        kh = qkv[:, dim + h * D: dim + (h + 1) * D]
        vh = qkv[:, 2 * dim + h * D: 2 * dim + (h + 1) * D]

        # QKNorm (RMSNorm over head_dim); qw already carries 1/sqrt(D).
        qh = qh * jax.lax.rsqrt(jnp.mean(qh * qh, axis=-1, keepdims=True) + eps) * qw
        kh = kh * jax.lax.rsqrt(jnp.mean(kh * kh, axis=-1, keepdims=True) + eps) * kw

        # RoPE in de-interleaved layout: out = cos*[e|o] + sin_signed*[o|e].
        # (single half-swap per tensor; full-width FMAs, no half-width vregs)
        qh_sw = jnp.concatenate([qh[:, D2:], qh[:, :D2]], axis=-1)
        kh_sw = jnp.concatenate([kh[:, D2:], kh[:, :D2]], axis=-1)
        qr = cos_f * qh + sin_s * qh_sw
        kr = cos_f * kh + sin_s * kh_sw

        q_out_ref[:, sl] = qr.astype(q_out_ref.dtype)
        k_out_ref[:, sl] = kr.astype(k_out_ref.dtype)
        v_out_ref[:, sl] = vh.astype(v_out_ref.dtype)


# ------------- Kernel 2: flash attention (online softmax) + out proj -------------


def _flash_attn_proj_kernel(
    q_ref,      # (TQ, dim)  bf16 rotated + pre-scaled q
    k_ref,      # (TK, dim)  bf16 rotated k
    v_ref,      # (TK, dim)  bf16 v
    wproj_ref,  # (dim, dim) bf16 == W_proj^T
    bproj_ref,  # (1, dim)   f32
    o_ref,      # (TQ, dim)  f32 output tile
    m_scr,      # (H, TQ, 1) f32 running max
    l_scr,      # (H, TQ, 1) f32 running sum
    acc_scr,    # (H, TQ, D) f32 running PV accumulator
    *,
    num_heads: int,
):
    H = num_heads
    dim = q_ref.shape[-1]
    D = dim // H
    j = pl.program_id(2)

    @pl.when(j == 0)
    def _init():
        m_scr[...] = jnp.full(m_scr.shape, -jnp.inf, dtype=m_scr.dtype)
        l_scr[...] = jnp.zeros(l_scr.shape, dtype=l_scr.dtype)
        acc_scr[...] = jnp.zeros(acc_scr.shape, dtype=acc_scr.dtype)

    for h in range(H):  # static unroll
        qh = q_ref[:, h * D:(h + 1) * D]
        kh = k_ref[:, h * D:(h + 1) * D]
        vh = v_ref[:, h * D:(h + 1) * D]

        # (TQ, TK) scores; 1/sqrt(D) already folded into q.
        s = jax.lax.dot_general(
            qh, kh, (((1,), (1,)), ((), ())),
            preferred_element_type=jnp.float32,
        )

        m_prev = m_scr[h]
        m_new = jnp.maximum(m_prev, jnp.max(s, axis=-1, keepdims=True))
        alpha = jnp.exp(m_prev - m_new)
        p = jnp.exp(s - m_new)
        l_scr[h] = alpha * l_scr[h] + jnp.sum(p, axis=-1, keepdims=True)
        acc_scr[h] = alpha * acc_scr[h] + jnp.dot(
            p.astype(v_ref.dtype), vh, preferred_element_type=jnp.float32)
        m_scr[h] = m_new

    @pl.when(j == pl.num_programs(2) - 1)
    def _finalize():
        # Per-head accumulation of the output projection: no concatenate,
        # only one (TQ, dim) live accumulator (the output block itself).
        for h in range(H):
            o_h = acc_scr[h] * pl.reciprocal(l_scr[h], approx=True)
            contrib = jnp.dot(
                o_h.astype(wproj_ref.dtype),
                wproj_ref[h * D:(h + 1) * D, :],
                preferred_element_type=jnp.float32,
            )
            if h == 0:
                o_ref[...] = contrib + bproj_ref[...]
            else:
                o_ref[...] = o_ref[...] + contrib


# ------------------------------ JAX wrapper -------------------------------


def _pick_seq_tile(L, cap):
    """Largest multiple-of-8 divisor of L that is <= cap, else L (full)."""
    if L <= cap:
        return L
    best = L
    for t in range(8, cap + 1, 8):
        if L % t == 0:
            best = t
    return best


def self_attention_pallas(x, params, pe, num_heads,
                          *, tile_proj=None, tile_q=None, tile_kv=None):
    B, L, dim = x.shape
    H = num_heads
    D = dim // H

    tl = tile_proj if tile_proj is not None else _pick_seq_tile(L, 512)
    tq = tile_q if tile_q is not None else _pick_seq_tile(L, 256)
    tk = tile_kv if tile_kv is not None else _pick_seq_tile(L, 256)
    assert L % tl == 0 and L % tq == 0 and L % tk == 0

    x = x.astype(jnp.float32)

    # flux pe[..., i, j] holds [[cos, -sin], [sin, cos]] per (position, pair).
    cos = pe[0, 0, :, :, 0, 0].astype(jnp.float32)        # (L, D//2)
    sin = pe[0, 0, :, :, 1, 0].astype(jnp.float32)        # (L, D//2)
    cos_full = jnp.concatenate([cos, cos], axis=-1)       # (L, D)
    sin_signed = jnp.concatenate([-sin, sin], axis=-1)    # (L, D)

    # De-interleave permutation on head_dim (even RoPE-pair elements first).
    perm = jnp.concatenate([jnp.arange(0, D, 2), jnp.arange(1, D, 2)])

    Wqkv = params["w_qkv"]                                # (3*dim, dim)
    bqkv = params["b_qkv"]                                # (3*dim,)
    W4 = Wqkv.reshape(3, H, D, dim)
    b4 = bqkv.reshape(3, H, D)
    Wqkv_p = jnp.stack([W4[0][:, perm, :], W4[1][:, perm, :], W4[2]], axis=0)
    bqkv_p = jnp.stack([b4[0][:, perm], b4[1][:, perm], b4[2]], axis=0)
    wqkv_t = Wqkv_p.reshape(3 * dim, dim).T.astype(jnp.bfloat16)   # (dim, 3*dim)
    bqkv_row = bqkv_p.reshape(1, 3 * dim).astype(jnp.float32)

    softmax_scale = 1.0 / (D ** 0.5)
    qw_p = (params["q_rms_w"][perm] * softmax_scale)[None, :].astype(jnp.float32)
    kw_p = params["k_rms_w"][perm][None, :].astype(jnp.float32)

    wproj_t = params["w_proj"].T.astype(jnp.bfloat16)              # (dim, dim)
    bproj_row = params["b_proj"][None, :].astype(jnp.float32)      # (1, dim)

    # NOTE: at production shapes (L~4096, dim~3072) raise vmem_limit_bytes and
    # shrink tiles accordingly; 32 MiB is safe on every TPU generation.
    vmem_limit = 32 * 1024 * 1024

    # ---- Kernel 1: QKV projection + QKNorm + RoPE (bf16 q/k/v to HBM) ----
    qkv_kernel = functools.partial(_qkv_rope_kernel, num_heads=H)
    q_rot, k_rot, v_lin = pl.pallas_call(
        qkv_kernel,
        out_shape=[jax.ShapeDtypeStruct((B, L, dim), jnp.bfloat16)] * 3,
        grid=(B, L // tl),
        in_specs=[
            pl.BlockSpec((None, tl, dim), lambda b, i: (b, i, 0)),
            pl.BlockSpec((dim, 3 * dim), lambda b, i: (0, 0)),
            pl.BlockSpec((1, 3 * dim), lambda b, i: (0, 0)),
            pl.BlockSpec((1, D), lambda b, i: (0, 0)),
            pl.BlockSpec((1, D), lambda b, i: (0, 0)),
            pl.BlockSpec((tl, D), lambda b, i: (i, 0)),
            pl.BlockSpec((tl, D), lambda b, i: (i, 0)),
        ],
        out_specs=[pl.BlockSpec((None, tl, dim), lambda b, i: (b, i, 0))] * 3,
        compiler_params=pltpu.CompilerParams(
            dimension_semantics=("parallel", "parallel"),
            vmem_limit_bytes=vmem_limit,
        ),
    )(x, wqkv_t, bqkv_row, qw_p, kw_p, cos_full, sin_signed)

    # ---- Kernel 2: flash attention + fused output projection ----
    attn_kernel = functools.partial(_flash_attn_proj_kernel, num_heads=H)
    out = pl.pallas_call(
        attn_kernel,
        out_shape=jax.ShapeDtypeStruct((B, L, dim), jnp.float32),
        grid=(B, L // tq, L // tk),
        in_specs=[
            pl.BlockSpec((None, tq, dim), lambda b, i, j: (b, i, 0)),
            pl.BlockSpec((None, tk, dim), lambda b, i, j: (b, j, 0)),
            pl.BlockSpec((None, tk, dim), lambda b, i, j: (b, j, 0)),
            pl.BlockSpec((dim, dim), lambda b, i, j: (0, 0)),
            pl.BlockSpec((1, dim), lambda b, i, j: (0, 0)),
        ],
        out_specs=pl.BlockSpec((None, tq, dim), lambda b, i, j: (b, i, 0)),
        scratch_shapes=[
            pltpu.VMEM((H, tq, 1), jnp.float32),   # running max
            pltpu.VMEM((H, tq, 1), jnp.float32),   # running sum
            pltpu.VMEM((H, tq, D), jnp.float32),   # PV accumulator
        ],
        compiler_params=pltpu.CompilerParams(
            dimension_semantics=("parallel", "parallel", "arbitrary"),
            vmem_limit_bytes=vmem_limit,
        ),
    )(q_rot, k_rot, v_lin, wproj_t, bproj_row)
    return out


# --------------------------- Pure-JAX reference ----------------------------


def self_attention_reference(x, params, pe, num_heads):
    """Literal translation of the PyTorch forward (interleaved RoPE)."""
    B, L, dim = x.shape
    H = num_heads
    D = dim // H
    eps = jnp.finfo(jnp.float32).eps

    qkv = x @ params["w_qkv"].T + params["b_qkv"]               # (B, L, 3*dim)
    qkv = qkv.reshape(B, L, 3, H, D).transpose(2, 0, 3, 1, 4)   # (3, B, H, L, D)
    q, k, v = qkv[0], qkv[1], qkv[2]

    def rms(t, w):
        return t * jax.lax.rsqrt(jnp.mean(t * t, axis=-1, keepdims=True) + eps) * w

    q = rms(q, params["q_rms_w"])
    k = rms(k, params["k_rms_w"])

    def rope(t):
        t_ = t.reshape(B, H, L, D // 2, 1, 2)
        out = pe[..., 0] * t_[..., 0] + pe[..., 1] * t_[..., 1]
        return out.reshape(B, H, L, D)

    q, k = rope(q), rope(k)

    s = jnp.einsum("bhld,bhmd->bhlm", q, k) / jnp.sqrt(jnp.float32(D))
    p = jax.nn.softmax(s, axis=-1)
    o = jnp.einsum("bhlm,bhmd->bhld", p, v)
    o = o.transpose(0, 2, 1, 3).reshape(B, L, dim)              # B H L D -> B L (H D)
    return o @ params["w_proj"].T + params["b_proj"]


# ---------------------------------- main -----------------------------------


def make_rope_pe(L, D, theta=10000.0):
    pos = jnp.arange(L, dtype=jnp.float32)
    omega = 1.0 / (theta ** (jnp.arange(0, D, 2, dtype=jnp.float32) / D))
    ang = pos[:, None] * omega[None, :]                          # (L, D//2)
    pe = jnp.stack(
        [jnp.cos(ang), -jnp.sin(ang), jnp.sin(ang), jnp.cos(ang)], axis=-1
    ).reshape(1, 1, L, D // 2, 2, 2)
    return pe.astype(jnp.float32)


if __name__ == "__main__":
    B, L, dim, num_heads = 2, 32, 64, 4
    D = dim // num_heads

    key = jax.random.PRNGKey(0)
    ks = jax.random.split(key, 7)
    params = {
        "w_qkv": 0.02 * jax.random.normal(ks[0], (3 * dim, dim), jnp.float32),
        "b_qkv": 0.01 * jax.random.normal(ks[1], (3 * dim,), jnp.float32),
        "q_rms_w": 1.0 + 0.05 * jax.random.normal(ks[2], (D,), jnp.float32),
        "k_rms_w": 1.0 + 0.05 * jax.random.normal(ks[3], (D,), jnp.float32),
        "w_proj": 0.02 * jax.random.normal(ks[4], (dim, dim), jnp.float32),
        "b_proj": 0.01 * jax.random.normal(ks[5], (dim,), jnp.float32),
    }
    x = jax.random.normal(ks[6], (B, L, dim), jnp.float32)
    pe = make_rope_pe(L, D)

    # Small tiles so the grid (2 x 2 x 4) actually exercises the flash loop.
    out = self_attention_pallas(x, params, pe, num_heads,
                                tile_proj=16, tile_q=16, tile_kv=8)
    out = jax.block_until_ready(out)

    ref = self_attention_reference(x, params, pe, num_heads)
    assert out.shape == (B, L, dim)
    err = float(jnp.max(jnp.abs(out - ref)))
    # bf16 MXU operands vs the f32 reference -> loosened tolerance.
    assert err < 2e-2, err
    print("KERNEL_OK")
</pallas_src>

<mosaic_0001>
module attributes {stable_mosaic.version = 11 : i64} {
  func.func @_qkv_rope_kernel(%arg0: i32, %arg1: i32, %arg2: memref<1x16x64xf32, #tpu.memory_space<vmem>>, %arg3: memref<64x192xbf16, #tpu.memory_space<vmem>>, %arg4: memref<1x192xf32, #tpu.memory_space<vmem>>, %arg5: memref<1x16xf32, #tpu.memory_space<vmem>>, %arg6: memref<1x16xf32, #tpu.memory_space<vmem>>, %arg7: memref<16x16xf32, #tpu.memory_space<vmem>>, %arg8: memref<16x16xf32, #tpu.memory_space<vmem>>, %arg9: memref<1x16x64xbf16, #tpu.memory_space<vmem>>, %arg10: memref<1x16x64xbf16, #tpu.memory_space<vmem>>, %arg11: memref<1x16x64xbf16, #tpu.memory_space<vmem>>) attributes {dimension_semantics = [#tpu.dimension_semantics<parallel>, #tpu.dimension_semantics<parallel>], iteration_bounds = array<i64: 2, 2>, scalar_prefetch = 0 : i64, scratch_operands = 0 : i64, tpu.core_type = #tpu.core_type<tc>, window_params = [{transform_indices = @transform_0, window_bounds = array<i64: 1, 16, 64>}, {pipeline_mode = #tpu.pipeline_mode<synchronous>, transform_indices = @transform_1, window_bounds = array<i64: 64, 192>}, {pipeline_mode = #tpu.pipeline_mode<synchronous>, transform_indices = @transform_2, window_bounds = array<i64: 1, 192>}, {pipeline_mode = #tpu.pipeline_mode<synchronous>, transform_indices = @transform_3, window_bounds = array<i64: 1, 16>}, {pipeline_mode = #tpu.pipeline_mode<synchronous>, transform_indices = @transform_4, window_bounds = array<i64: 1, 16>}, {transform_indices = @transform_5, window_bounds = array<i64: 16, 16>}, {transform_indices = @transform_6, window_bounds = array<i64: 16, 16>}, {transform_indices = @transform_7, window_bounds = array<i64: 1, 16, 64>}, {transform_indices = @transform_8, window_bounds = array<i64: 1, 16, 64>}, {transform_indices = @transform_9, window_bounds = array<i64: 1, 16, 64>}]} {
    %c0 = arith.constant 0 : index
    %c0_0 = arith.constant 0 : index
    %c0_1 = arith.constant 0 : index
    %0 = vector.load %arg2[%c0, %c0_0, %c0_1] : memref<1x16x64xf32, #tpu.memory_space<vmem>>, vector<1x16x64xf32>
    %1 = vector.shape_cast %0 : vector<1x16x64xf32> to vector<16x64xf32>
    %2 = arith.truncf %1 : vector<16x64xf32> to vector<16x64xbf16>
    %c0_2 = arith.constant 0 : index
    %c0_3 = arith.constant 0 : index
    %3 = vector.load %arg3[%c0_2, %c0_3] : memref<64x192xbf16, #tpu.memory_space<vmem>>, vector<64x192xbf16>
    %cst = arith.constant dense<0.000000e+00> : vector<16x192xf32>
    %4 = tpu.matmul %2, %3, %cst {dimension_numbers = #tpu.dot_dimension_numbers<[1], [0], [0], [1], [0, 0, 1, 1], [], []>} : vector<16x64xbf16>, vector<64x192xbf16>, vector<16x192xf32> -> vector<16x192xf32>
    %c0_4 = arith.constant 0 : index
    %c0_5 = arith.constant 0 : index
    %5 = vector.load %arg4[%c0_4, %c0_5] : memref<1x192xf32, #tpu.memory_space<vmem>>, vector<1x192xf32>
    %6 = vector.broadcast %5 : vector<1x192xf32> to vector<16x192xf32>
    %7 = arith.addf %4, %6 : vector<16x192xf32>
    %c0_6 = arith.constant 0 : index
    %c0_7 = arith.constant 0 : index
    %8 = vector.load %arg7[%c0_6, %c0_7] : memref<16x16xf32, #tpu.memory_space<vmem>>, vector<16x16xf32>
    %c0_8 = arith.constant 0 : index
    %c0_9 = arith.constant 0 : index
    %9 = vector.load %arg8[%c0_8, %c0_9] : memref<16x16xf32, #tpu.memory_space<vmem>>, vector<16x16xf32>
    %c0_10 = arith.constant 0 : index
    %c0_11 = arith.constant 0 : index
    %10 = vector.load %arg5[%c0_10, %c0_11] : memref<1x16xf32, #tpu.memory_space<vmem>>, vector<1x16xf32>
    %c0_12 = arith.constant 0 : index
    %c0_13 = arith.constant 0 : index
    %11 = vector.load %arg6[%c0_12, %c0_13] : memref<1x16xf32, #tpu.memory_space<vmem>>, vector<1x16xf32>
    %12 = vector.extract_strided_slice %7 {offsets = [0, 0], sizes = [16, 16], strides = [1, 1]} : vector<16x192xf32> to vector<16x16xf32>
    %13 = vector.extract_strided_slice %7 {offsets = [0, 64], sizes = [16, 16], strides = [1, 1]} : vector<16x192xf32> to vector<16x16xf32>
    %14 = vector.extract_strided_slice %7 {offsets = [0, 128], sizes = [16, 16], strides = [1, 1]} : vector<16x192xf32> to vector<16x16xf32>
    %15 = arith.mulf %12, %12 : vector<16x16xf32>
    %cst_14 = arith.constant dense<0.000000e+00> : vector<16xf32>
    %16 = vector.multi_reduction <add>, %15, %cst_14 [1] : vector<16x16xf32> to vector<16xf32>
    %17 = vector.shape_cast %16 : vector<16xf32> to vector<16x1xf32>
    %cst_15 = arith.constant 1.600000e+01 : f32
    %18 = vector.broadcast %cst_15 : f32 to vector<16x1xf32>
    %19 = arith.divf %17, %18 : vector<16x1xf32>
    %cst_16 = arith.constant 1.1920929E-7 : f32
    %20 = vector.broadcast %cst_16 : f32 to vector<16x1xf32>
    %21 = arith.addf %19, %20 : vector<16x1xf32>
    %22 = math.rsqrt %21 : vector<16x1xf32>
    %23 = vector.broadcast %22 : vector<16x1xf32> to vector<16x16xf32>
    %24 = arith.mulf %12, %23 : vector<16x16xf32>
    %25 = vector.broadcast %10 : vector<1x16xf32> to vector<16x16xf32>
    %26 = arith.mulf %24, %25 : vector<16x16xf32>
    %27 = arith.mulf %13, %13 : vector<16x16xf32>
    %cst_17 = arith.constant dense<0.000000e+00> : vector<16xf32>
    %28 = vector.multi_reduction <add>, %27, %cst_17 [1] : vector<16x16xf32> to vector<16xf32>
    %29 = vector.shape_cast %28 : vector<16xf32> to vector<16x1xf32>
    %cst_18 = arith.constant 1.600000e+01 : f32
    %30 = vector.broadcast %cst_18 : f32 to vector<16x1xf32>
    %31 = arith.divf %29, %30 : vector<16x1xf32>
    %cst_19 = arith.constant 1.1920929E-7 : f32
    %32 = vector.broadcast %cst_19 : f32 to vector<16x1xf32>
    %33 = arith.addf %31, %32 : vector<16x1xf32>
    %34 = math.rsqrt %33 : vector<16x1xf32>
    %35 = vector.broadcast %34 : vector<16x1xf32> to vector<16x16xf32>
    %36 = arith.mulf %13, %35 : vector<16x16xf32>
    %37 = vector.broadcast %11 : vector<1x16xf32> to vector<16x16xf32>
    %38 = arith.mulf %36, %37 : vector<16x16xf32>
    %39 = vector.extract_strided_slice %26 {offsets = [0, 8], sizes = [16, 8], strides = [1, 1]} : vector<16x16xf32> to vector<16x8xf32>
    %40 = vector.extract_strided_slice %26 {offsets = [0, 0], sizes = [16, 8], strides = [1, 1]} : vector<16x16xf32> to vector<16x8xf32>
    %41 = tpu.concatenate %39, %40 in 1 : vector<16x8xf32>, vector<16x8xf32> -> vector<16x16xf32>
    %42 = vector.extract_strided_slice %38 {offsets = [0, 8], sizes = [16, 8], strides = [1, 1]} : vector<16x16xf32> to vector<16x8xf32>
    %43 = vector.extract_strided_slice %38 {offsets = [0, 0], sizes = [16, 8], strides = [1, 1]} : vector<16x16xf32> to vector<16x8xf32>
    %44 = tpu.concatenate %42, %43 in 1 : vector<16x8xf32>, vector<16x8xf32> -> vector<16x16xf32>
    %45 = arith.mulf %8, %26 : vector<16x16xf32>
    %46 = arith.mulf %9, %41 : vector<16x16xf32>
    %47 = arith.addf %45, %46 : vector<16x16xf32>
    %48 = arith.mulf %8, %38 : vector<16x16xf32>
    %49 = arith.mulf %9, %44 : vector<16x16xf32>
    %50 = arith.addf %48, %49 : vector<16x16xf32>
    %51 = arith.truncf %47 : vector<16x16xf32> to vector<16x16xbf16>
    %c0_20 = arith.constant 0 : index
    %c0_21 = arith.constant 0 : index
    %c0_22 = arith.constant 0 : index
    %52 = vector.load %arg9[%c0_20, %c0_21, %c0_22] : memref<1x16x64xbf16, #tpu.memory_space<vmem>>, vector<1x16x16xbf16>
    %53 = vector.shape_cast %52 : vector<1x16x16xbf16> to vector<16x16xbf16>
    %54 = vector.shape_cast %51 : vector<16x16xbf16> to vector<1x16x16xbf16>
    tpu.vector_store %arg9[%c0_20, %c0_21, %c0_22], %54 {strides = array<i32>} : memref<1x16x64xbf16, #tpu.memory_space<vmem>>, vector<1x16x16xbf16>,
    %55 = arith.truncf %50 : vector<16x16xf32> to vector<16x16xbf16>
    %c0_23 = arith.constant 0 : index
    %c0_24 = arith.constant 0 : index
    %c0_25 = arith.constant 0 : index
    %56 = vector.load %arg10[%c0_23, %c0_24, %c0_25] : memref<1x16x64xbf16, #tpu.memory_space<vmem>>, vector<1x16x16xbf16>
    %57 = vector.shape_cast %56 : vector<1x16x16xbf16> to vector<16x16xbf16>
    %58 = vector.shape_cast %55 : vector<16x16xbf16> to vector<1x16x16xbf16>
    tpu.vector_store %arg10[%c0_23, %c0_24, %c0_25], %58 {strides = array<i32>} : memref<1x16x64xbf16, #tpu.memory_space<vmem>>, vector<1x16x16xbf16>,
    %59 = arith.truncf %14 : vector<16x16xf32> to vector<16x16xbf16>
    %c0_26 = arith.constant 0 : index
    %c0_27 = arith.constant 0 : index
    %c0_28 = arith.constant 0 : index
    %60 = vector.load %arg11[%c0_26, %c0_27, %c0_28] : memref<1x16x64xbf16, #tpu.memory_space<vmem>>, vector<1x16x16xbf16>
    %61 = vector.shape_cast %60 : vector<1x16x16xbf16> to vector<16x16xbf16>
    %62 = vector.shape_cast %59 : vector<16x16xbf16> to vector<1x16x16xbf16>
    tpu.vector_store %arg11[%c0_26, %c0_27, %c0_28], %62 {strides = array<i32>} : memref<1x16x64xbf16, #tpu.memory_space<vmem>>, vector<1x16x16xbf16>,
    %63 = vector.extract_strided_slice %7 {offsets = [0, 16], sizes = [16, 16], strides = [1, 1]} : vector<16x192xf32> to vector<16x16xf32>
    %64 = vector.extract_strided_slice %7 {offsets = [0, 80], sizes = [16, 16], strides = [1, 1]} : vector<16x192xf32> to vector<16x16xf32>
    %65 = vector.extract_strided_slice %7 {offsets = [0, 144], sizes = [16, 16], strides = [1, 1]} : vector<16x192xf32> to vector<16x16xf32>
    %66 = arith.mulf %63, %63 : vector<16x16xf32>
    %cst_29 = arith.constant dense<0.000000e+00> : vector<16xf32>
    %67 = vector.multi_reduction <add>, %66, %cst_29 [1] : vector<16x16xf32> to vector<16xf32>
    %68 = vector.shape_cast %67 : vector<16xf32> to vector<16x1xf32>
    %cst_30 = arith.constant 1.600000e+01 : f32
    %69 = vector.broadcast %cst_30 : f32 to vector<16x1xf32>
    %70 = arith.divf %68, %69 : vector<16x1xf32>
    %cst_31 = arith.constant 1.1920929E-7 : f32
    %71 = vector.broadcast %cst_31 : f32 to vector<16x1xf32>
    %72 = arith.addf %70, %71 : vector<16x1xf32>
    %73 = math.rsqrt %72 : vector<16x1xf32>
    %74 = vector.broadcast %73 : vector<16x1xf32> to vector<16x16xf32>
    %75 = arith.mulf %63, %74 : vector<16x16xf32>
    %76 = vector.broadcast %10 : vector<1x16xf32> to vector<16x16xf32>
    %77 = arith.mulf %75, %76 : vector<16x16xf32>
    %78 = arith.mulf %64, %64 : vector<16x16xf32>
    %cst_32 = arith.constant dense<0.000000e+00> : vector<16xf32>
    %79 = vector.multi_reduction <add>, %78, %cst_32 [1] : vector<16x16xf32> to vector<16xf32>
    %80 = vector.shape_cast %79 : vector<16xf32> to vector<16x1xf32>
    %cst_33 = arith.constant 1.600000e+01 : f32
    %81 = vector.broadcast %cst_33 : f32 to vector<16x1xf32>
    %82 = arith.divf %80, %81 : vector<16x1xf32>
    %cst_34 = arith.constant 1.1920929E-7 : f32
    %83 = vector.broadcast %cst_34 : f32 to vector<16x1xf32>
    %84 = arith.addf %82, %83 : vector<16x1xf32>
    %85 = math.rsqrt %84 : vector<16x1xf32>
    %86 = vector.broadcast %85 : vector<16x1xf32> to vector<16x16xf32>
    %87 = arith.mulf %64, %86 : vector<16x16xf32>
    %88 = vector.broadcast %11 : vector<1x16xf32> to vector<16x16xf32>
    %89 = arith.mulf %87, %88 : vector<16x16xf32>
    %90 = vector.extract_strided_slice %77 {offsets = [0, 8], sizes = [16, 8], strides = [1, 1]} : vector<16x16xf32> to vector<16x8xf32>
    %91 = vector.extract_strided_slice %77 {offsets = [0, 0], sizes = [16, 8], strides = [1, 1]} : vector<16x16xf32> to vector<16x8xf32>
    %92 = tpu.concatenate %90, %91 in 1 : vector<16x8xf32>, vector<16x8xf32> -> vector<16x16xf32>
    %93 = vector.extract_strided_slice %89 {offsets = [0, 8], sizes = [16, 8], strides = [1, 1]} : vector<16x16xf32> to vector<16x8xf32>
    %94 = vector.extract_strided_slice %89 {offsets = [0, 0], sizes = [16, 8], strides = [1, 1]} : vector<16x16xf32> to vector<16x8xf32>
    %95 = tpu.concatenate %93, %94 in 1 : vector<16x8xf32>, vector<16x8xf32> -> vector<16x16xf32>
    %96 = arith.mulf %8, %77 : vector<16x16xf32>
    %97 = arith.mulf %9, %92 : vector<16x16xf32>
    %98 = arith.addf %96, %97 : vector<16x16xf32>
    %99 = arith.mulf %8, %89 : vector<16x16xf32>
    %100 = arith.mulf %9, %95 : vector<16x16xf32>
    %101 = arith.addf %99, %100 : vector<16x16xf32>
    %102 = arith.truncf %98 : vector<16x16xf32> to vector<16x16xbf16>
    %c0_35 = arith.constant 0 : index
    %c0_36 = arith.constant 0 : index
    %c16 = arith.constant 16 : index
    %103 = vector.load %arg9[%c0_35, %c0_36, %c16] : memref<1x16x64xbf16, #tpu.memory_space<vmem>>, vector<1x16x16xbf16>
    %104 = vector.shape_cast %103 : vector<1x16x16xbf16> to vector<16x16xbf16>
    %105 = vector.shape_cast %102 : vector<16x16xbf16> to vector<1x16x16xbf16>
    tpu.vector_store %arg9[%c0_35, %c0_36, %c16], %105 {strides = array<i32>} : memref<1x16x64xbf16, #tpu.memory_space<vmem>>, vector<1x16x16xbf16>,
    %106 = arith.truncf %101 : vector<16x16xf32> to vector<16x16xbf16>
    %c0_37 = arith.constant 0 : index
    %c0_38 = arith.constant 0 : index
    %c16_39 = arith.constant 16 : index
    %107 = vector.load %arg10[%c0_37, %c0_38, %c16_39] : memref<1x16x64xbf16, #tpu.memory_space<vmem>>, vector<1x16x16xbf16>
    %108 = vector.shape_cast %107 : vector<1x16x16xbf16> to vector<16x16xbf16>
    %109 = vector.shape_cast %106 : vector<16x16xbf16> to vector<1x16x16xbf16>
    tpu.vector_store %arg10[%c0_37, %c0_38, %c16_39], %109 {strides = array<i32>} : memref<1x16x64xbf16, #tpu.memory_space<vmem>>, vector<1x16x16xbf16>,
    %110 = arith.truncf %65 : vector<16x16xf32> to vector<16x16xbf16>
    %c0_40 = arith.constant 0 : index
    %c0_41 = arith.constant 0 : index
    %c16_42 = arith.constant 16 : index
    %111 = vector.load %arg11[%c0_40, %c0_41, %c16_42] : memref<1x16x64xbf16, #tpu.memory_space<vmem>>, vector<1x16x16xbf16>
    %112 = vector.shape_cast %111 : vector<1x16x16xbf16> to vector<16x16xbf16>
    %113 = vector.shape_cast %110 : vector<16x16xbf16> to vector<1x16x16xbf16>
    tpu.vector_store %arg11[%c0_40, %c0_41, %c16_42], %113 {strides = array<i32>} : memref<1x16x64xbf16, #tpu.memory_space<vmem>>, vector<1x16x16xbf16>,
    %114 = vector.extract_strided_slice %7 {offsets = [0, 32], sizes = [16, 16], strides = [1, 1]} : vector<16x192xf32> to vector<16x16xf32>
    %115 = vector.extract_strided_slice %7 {offsets = [0, 96], sizes = [16, 16], strides = [1, 1]} : vector<16x192xf32> to vector<16x16xf32>
    %116 = vector.extract_strided_slice %7 {offsets = [0, 160], sizes = [16, 16], strides = [1, 1]} : vector<16x192xf32> to vector<16x16xf32>
    %117 = arith.mulf %114, %114 : vector<16x16xf32>
    %cst_43 = arith.constant dense<0.000000e+00> : vector<16xf32>
    %118 = vector.multi_reduction <add>, %117, %cst_43 [1] : vector<16x16xf32> to vector<16xf32>
    %119 = vector.shape_cast %118 : vector<16xf32> to vector<16x1xf32>
    %cst_44 = arith.constant 1.600000e+01 : f32
    %120 = vector.broadcast %cst_44 : f32 to vector<16x1xf32>
    %121 = arith.divf %119, %120 : vector<16x1xf32>
    %cst_45 = arith.constant 1.1920929E-7 : f32
    %122 = vector.broadcast %cst_45 : f32 to vector<16x1xf32>
    %123 = arith.addf %121, %122 : vector<16x1xf32>
    %124 = math.rsqrt %123 : vector<16x1xf32>
    %125 = vector.broadcast %124 : vector<16x1xf32> to vector<16x16xf32>
    %126 = arith.mulf %114, %125 : vector<16x16xf32>
    %127 = vector.broadcast %10 : vector<1x16xf32> to vector<16x16xf32>
    %128 = arith.mulf %126, %127 : vector<16x16xf32>
    %129 = arith.mulf %115, %115 : vector<16x16xf32>
    %cst_46 = arith.constant dense<0.000000e+00> : vector<16xf32>
    %130 = vector.multi_reduction <add>, %129, %cst_46 [1] : vector<16x16xf32> to vector<16xf32>
    %131 = vector.shape_cast %130 : vector<16xf32> to vector<16x1xf32>
    %cst_47 = arith.constant 1.600000e+01 : f32
    %132 = vector.broadcast %cst_47 : f32 to vector<16x1xf32>
    %133 = arith.divf %131, %132 : vector<16x1xf32>
    %cst_48 = arith.constant 1.1920929E-7 : f32
    %134 = vector.broadcast %cst_48 : f32 to vector<16x1xf32>
    %135 = arith.addf %133, %134 : vector<16x1xf32>
    %136 = math.rsqrt %135 : vector<16x1xf32>
    %137 = vector.broadcast %136 : vector<16x1xf32> to vector<16x16xf32>
    %138 = arith.mulf %115, %137 : vector<16x16xf32>
    %139 = vector.broadcast %11 : vector<1x16xf32> to vector<16x16xf32>
    %140 = arith.mulf %138, %139 : vector<16x16xf32>
    %141 = vector.extract_strided_slice %128 {offsets = [0, 8], sizes = [16, 8], strides = [1, 1]} : vector<16x16xf32> to vector<16x8xf32>
    %142 = vector.extract_strided_slice %128 {offsets = [0, 0], sizes = [16, 8], strides = [1, 1]} : vector<16x16xf32> to vector<16x8xf32>
    %143 = tpu.concatenate %141, %142 in 1 : vector<16x8xf32>, vector<16x8xf32> -> vector<16x16xf32>
    %144 = vector.extract_strided_slice %140 {offsets = [0, 8], sizes = [16, 8], strides = [1, 1]} : vector<16x16xf32> to vector<16x8xf32>
    %145 = vector.extract_strided_slice %140 {offsets = [0, 0], sizes = [16, 8], strides = [1, 1]} : vector<16x16xf32> to vector<16x8xf32>
    %146 = tpu.concatenate %144, %145 in 1 : vector<16x8xf32>, vector<16x8xf32> -> vector<16x16xf32>
    %147 = arith.mulf %8, %128 : vector<16x16xf32>
    %148 = arith.mulf %9, %143 : vector<16x16xf32>
    %149 = arith.addf %147, %148 : vector<16x16xf32>
    %150 = arith.mulf %8, %140 : vector<16x16xf32>
    %151 = arith.mulf %9, %146 : vector<16x16xf32>
    %152 = arith.addf %150, %151 : vector<16x16xf32>
    %153 = arith.truncf %149 : vector<16x16xf32> to vector<16x16xbf16>
    %c0_49 = arith.constant 0 : index
    %c0_50 = arith.constant 0 : index
    %c32 = arith.constant 32 : index
    %154 = vector.load %arg9[%c0_49, %c0_50, %c32] : memref<1x16x64xbf16, #tpu.memory_space<vmem>>, vector<1x16x16xbf16>
    %155 = vector.shape_cast %154 : vector<1x16x16xbf16> to vector<16x16xbf16>
    %156 = vector.shape_cast %153 : vector<16x16xbf16> to vector<1x16x16xbf16>
    tpu.vector_store %arg9[%c0_49, %c0_50, %c32], %156 {strides = array<i32>} : memref<1x16x64xbf16, #tpu.memory_space<vmem>>, vector<1x16x16xbf16>,
    %157 = arith.truncf %152 : vector<16x16xf32> to vector<16x16xbf16>
    %c0_51 = arith.constant 0 : index
    %c0_52 = arith.constant 0 : index
    %c32_53 = arith.constant 32 : index
    %158 = vector.load %arg10[%c0_51, %c0_52, %c32_53] : memref<1x16x64xbf16, #tpu.memory_space<vmem>>, vector<1x16x16xbf16>
    %159 = vector.shape_cast %158 : vector<1x16x16xbf16> to vector<16x16xbf16>
    %160 = vector.shape_cast %157 : vector<16x16xbf16> to vector<1x16x16xbf16>
    tpu.vector_store %arg10[%c0_51, %c0_52, %c32_53], %160 {strides = array<i32>} : memref<1x16x64xbf16, #tpu.memory_space<vmem>>, vector<1x16x16xbf16>,
    %161 = arith.truncf %116 : vector<16x16xf32> to vector<16x16xbf16>
    %c0_54 = arith.constant 0 : index
    %c0_55 = arith.constant 0 : index
    %c32_56 = arith.constant 32 : index
    %162 = vector.load %arg11[%c0_54, %c0_55, %c32_56] : memref<1x16x64xbf16, #tpu.memory_space<vmem>>, vector<1x16x16xbf16>
    %163 = vector.shape_cast %162 : vector<1x16x16xbf16> to vector<16x16xbf16>
    %164 = vector.shape_cast %161 : vector<16x16xbf16> to vector<1x16x16xbf16>
    tpu.vector_store %arg11[%c0_54, %c0_55, %c32_56], %164 {strides = array<i32>} : memref<1x16x64xbf16, #tpu.memory_space<vmem>>, vector<1x16x16xbf16>,
    %165 = vector.extract_strided_slice %7 {offsets = [0, 48], sizes = [16, 16], strides = [1, 1]} : vector<16x192xf32> to vector<16x16xf32>
    %166 = vector.extract_strided_slice %7 {offsets = [0, 112], sizes = [16, 16], strides = [1, 1]} : vector<16x192xf32> to vector<16x16xf32>
    %167 = vector.extract_strided_slice %7 {offsets = [0, 176], sizes = [16, 16], strides = [1, 1]} : vector<16x192xf32> to vector<16x16xf32>
    %168 = arith.mulf %165, %165 : vector<16x16xf32>
    %cst_57 = arith.constant dense<0.000000e+00> : vector<16xf32>
    %169 = vector.multi_reduction <add>, %168, %cst_57 [1] : vector<16x16xf32> to vector<16xf32>
    %170 = vector.shape_cast %169 : vector<16xf32> to vector<16x1xf32>
    %cst_58 = arith.constant 1.600000e+01 : f32
    %171 = vector.broadcast %cst_58 : f32 to vector<16x1xf32>
    %172 = arith.divf %170, %171 : vector<16x1xf32>
    %cst_59 = arith.constant 1.1920929E-7 : f32
    %173 = vector.broadcast %cst_59 : f32 to vector<16x1xf32>
    %174 = arith.addf %172, %173 : vector<16x1xf32>
    %175 = math.rsqrt %174 : vector<16x1xf32>
    %176 = vector.broadcast %175 : vector<16x1xf32> to vector<16x16xf32>
    %177 = arith.mulf %165, %176 : vector<16x16xf32>
    %178 = vector.broadcast %10 : vector<1x16xf32> to vector<16x16xf32>
    %179 = arith.mulf %177, %178 : vector<16x16xf32>
    %180 = arith.mulf %166, %166 : vector<16x16xf32>
    %cst_60 = arith.constant dense<0.000000e+00> : vector<16xf32>
    %181 = vector.multi_reduction <add>, %180, %cst_60 [1] : vector<16x16xf32> to vector<16xf32>
    %182 = vector.shape_cast %181 : vector<16xf32> to vector<16x1xf32>
    %cst_61 = arith.constant 1.600000e+01 : f32
    %183 = vector.broadcast %cst_61 : f32 to vector<16x1xf32>
    %184 = arith.divf %182, %183 : vector<16x1xf32>
    %cst_62 = arith.constant 1.1920929E-7 : f32
    %185 = vector.broadcast %cst_62 : f32 to vector<16x1xf32>
    %186 = arith.addf %184, %185 : vector<16x1xf32>
    %187 = math.rsqrt %186 : vector<16x1xf32>
    %188 = vector.broadcast %187 : vector<16x1xf32> to vector<16x16xf32>
    %189 = arith.mulf %166, %188 : vector<16x16xf32>
    %190 = vector.broadcast %11 : vector<1x16xf32> to vector<16x16xf32>
    %191 = arith.mulf %189, %190 : vector<16x16xf32>
    %192 = vector.extract_strided_slice %179 {offsets = [0, 8], sizes = [16, 8], strides = [1, 1]} : vector<16x16xf32> to vector<16x8xf32>
    %193 = vector.extract_strided_slice %179 {offsets = [0, 0], sizes = [16, 8], strides = [1, 1]} : vector<16x16xf32> to vector<16x8xf32>
    %194 = tpu.concatenate %192, %193 in 1 : vector<16x8xf32>, vector<16x8xf32> -> vector<16x16xf32>
    %195 = vector.extract_strided_slice %191 {offsets = [0, 8], sizes = [16, 8], strides = [1, 1]} : vector<16x16xf32> to vector<16x8xf32>
    %196 = vector.extract_strided_slice %191 {offsets = [0, 0], sizes = [16, 8], strides = [1, 1]} : vector<16x16xf32> to vector<16x8xf32>
    %197 = tpu.concatenate %195, %196 in 1 : vector<16x8xf32>, vector<16x8xf32> -> vector<16x16xf32>
    %198 = arith.mulf %8, %179 : vector<16x16xf32>
    %199 = arith.mulf %9, %194 : vector<16x16xf32>
    %200 = arith.addf %198, %199 : vector<16x16xf32>
    %201 = arith.mulf %8, %191 : vector<16x16xf32>
    %202 = arith.mulf %9, %197 : vector<16x16xf32>
    %203 = arith.addf %201, %202 : vector<16x16xf32>
    %204 = arith.truncf %200 : vector<16x16xf32> to vector<16x16xbf16>
    %c0_63 = arith.constant 0 : index
    %c0_64 = arith.constant 0 : index
    %c48 = arith.constant 48 : index
    %205 = vector.load %arg9[%c0_63, %c0_64, %c48] : memref<1x16x64xbf16, #tpu.memory_space<vmem>>, vector<1x16x16xbf16>
    %206 = vector.shape_cast %205 : vector<1x16x16xbf16> to vector<16x16xbf16>
    %207 = vector.shape_cast %204 : vector<16x16xbf16> to vector<1x16x16xbf16>
    tpu.vector_store %arg9[%c0_63, %c0_64, %c48], %207 {strides = array<i32>} : memref<1x16x64xbf16, #tpu.memory_space<vmem>>, vector<1x16x16xbf16>,
    %208 = arith.truncf %203 : vector<16x16xf32> to vector<16x16xbf16>
    %c0_65 = arith.constant 0 : index
    %c0_66 = arith.constant 0 : index
    %c48_67 = arith.constant 48 : index
    %209 = vector.load %arg10[%c0_65, %c0_66, %c48_67] : memref<1x16x64xbf16, #tpu.memory_space<vmem>>, vector<1x16x16xbf16>
    %210 = vector.shape_cast %209 : vector<1x16x16xbf16> to vector<16x16xbf16>
    %211 = vector.shape_cast %208 : vector<16x16xbf16> to vector<1x16x16xbf16>
    tpu.vector_store %arg10[%c0_65, %c0_66, %c48_67], %211 {strides = array<i32>} : memref<1x16x64xbf16, #tpu.memory_space<vmem>>, vector<1x16x16xbf16>,
    %212 = arith.truncf %167 : vector<16x16xf32> to vector<16x16xbf16>
    %c0_68 = arith.constant 0 : index
    %c0_69 = arith.constant 0 : index
    %c48_70 = arith.constant 48 : index
    %213 = vector.load %arg11[%c0_68, %c0_69, %c48_70] : memref<1x16x64xbf16, #tpu.memory_space<vmem>>, vector<1x16x16xbf16>
    %214 = vector.shape_cast %213 : vector<1x16x16xbf16> to vector<16x16xbf16>
    %215 = vector.shape_cast %212 : vector<16x16xbf16> to vector<1x16x16xbf16>
    tpu.vector_store %arg11[%c0_68, %c0_69, %c48_70], %215 {strides = array<i32>} : memref<1x16x64xbf16, #tpu.memory_space<vmem>>, vector<1x16x16xbf16>,
    return
  }
  func.func @transform_0(%arg0: i32, %arg1: i32) -> (i32, i32, i32) {
    %c0_i32 = arith.constant 0 : i32
    %c0_i32_0 = arith.constant 0 : i32
    return %arg0, %arg1, %c0_i32 : i32, i32, i32
  }
  func.func @transform_1(%arg0: i32, %arg1: i32) -> (i32, i32) {
    %c0_i32 = arith.constant 0 : i32
    %c0_i32_0 = arith.constant 0 : i32
    %c0_i32_1 = arith.constant 0 : i32
    return %c0_i32, %c0_i32_0 : i32, i32
  }
  func.func @transform_2(%arg0: i32, %arg1: i32) -> (i32, i32) {
    %c0_i32 = arith.constant 0 : i32
    %c0_i32_0 = arith.constant 0 : i32
    %c0_i32_1 = arith.constant 0 : i32
    return %c0_i32, %c0_i32_0 : i32, i32
  }
  func.func @transform_3(%arg0: i32, %arg1: i32) -> (i32, i32) {
    %c0_i32 = arith.constant 0 : i32
    %c0_i32_0 = arith.constant 0 : i32
    %c0_i32_1 = arith.constant 0 : i32
    return %c0_i32, %c0_i32_0 : i32, i32
  }
  func.func @transform_4(%arg0: i32, %arg1: i32) -> (i32, i32) {
    %c0_i32 = arith.constant 0 : i32
    %c0_i32_0 = arith.constant 0 : i32
    %c0_i32_1 = arith.constant 0 : i32
    return %c0_i32, %c0_i32_0 : i32, i32
  }
  func.func @transform_5(%arg0: i32, %arg1: i32) -> (i32, i32) {
    %c0_i32 = arith.constant 0 : i32
    %c0_i32_0 = arith.constant 0 : i32
    return %arg1, %c0_i32 : i32, i32
  }
  func.func @transform_6(%arg0: i32, %arg1: i32) -> (i32, i32) {
    %c0_i32 = arith.constant 0 : i32
    %c0_i32_0 = arith.constant 0 : i32
    return %arg1, %c0_i32 : i32, i32
  }
  func.func @transform_7(%arg0: i32, %arg1: i32) -> (i32, i32, i32) {
    %c0_i32 = arith.constant 0 : i32
    %c0_i32_0 = arith.constant 0 : i32
    return %arg0, %arg1, %c0_i32 : i32, i32, i32
  }
  func.func @transform_8(%arg0: i32, %arg1: i32) -> (i32, i32, i32) {
    %c0_i32 = arith.constant 0 : i32
    %c0_i32_0 = arith.constant 0 : i32
    return %arg0, %arg1, %c0_i32 : i32, i32, i32
  }
  func.func @transform_9(%arg0: i32, %arg1: i32) -> (i32, i32, i32) {
    %c0_i32 = arith.constant 0 : i32
    %c0_i32_0 = arith.constant 0 : i32
    return %arg0, %arg1, %c0_i32 : i32, i32, i32
  }
}

</mosaic_0001>

<bundles_post_ra>
// kernel: tpu_custom_call.1
= control target key start
LH: loop header
LB: loop body
LE: loop exit
PB: predicated region body
PF: predicated region fallthrough
CT: control target
= control target key end

     0   :  { %s2550_s0 = inlined_call_operand.vmem [shape: f32[2,32,64], index: 0, kind: input, shape index: {}]   ;;  %s2551_s1 = inlined_call_operand.hbm [shape: bf16[64,192], index: 1, kind: input, shape index: {}]   ;;  %s2552_s2 = inlined_call_operand.vmem [shape: f32[1,192], index: 2, kind: input, shape index: {}]   ;;  %s2553_s3 = inlined_call_operand.vmem [shape: f32[1,16], index: 3, kind: input, shape index: {}]   ;;  %s2554_s4 = inlined_call_operand.vmem [shape: f32[1,16], index: 4, kind: input, shape index: {}]   ;;  %s2555_s5 = inlined_call_operand.vmem [shape: f32[32,16], index: 5, kind: input, shape index: {}]   ;;  %s2556_s6 = inlined_call_operand.vmem [shape: f32[32,16], index: 6, kind: input, shape index: {}]   ;;  %s2557_s7 = inlined_call_operand.hbm [shape: bf16[2,32,64], index: 7, kind: output, shape index: {0}]   ;;  %s2558_s8 = inlined_call_operand.hbm [shape: bf16[2,32,64], index: 8, kind: output, shape index: {1}]   ;;  %s2559_s9 = inlined_call_operand.hbm [shape: bf16[2,32,64], index: 9, kind: output, shape index: {2}]  }
   0x1   :  { %2585 = sst [smem:[#allocation15_spill]] %s2550_s0 }
   0x2   :  { %2586 = sst [smem:[#allocation16_spill]] %s2551_s1 }
   0x3   :  { %2587 = sst [smem:[#allocation17_spill]] %s2552_s2 }
   0x4   :  { %2588 = sst [smem:[#allocation18_spill]] %s2553_s3 }
   0x5   :  { %2589 = sst [smem:[#allocation19_spill]] %s2554_s4 }
   0x6   :  { %2590 = sst [smem:[#allocation20_spill]] %s2555_s5 }
   0x7   :  { %15 = vsyncpa [#allocation3], 0 }
   0x8   :  { %16 = vsyncpa [#allocation4], 0 }
   0x9   :  { %18 = vsyncpa [#allocation4 + $0x1], 0 }
   0xa   :  { %19 = vsyncpa [#allocation7], 0 }
   0xb   :  { %21 = vsyncpa [#allocation7 + $0x1], 0  ;;  %s1942_s30 = smov 0   ;;  %s1944_s10 = smov 0  }
   0xc   :  { %s1946_s11 = smov 0   ;;  %s1948_s12 = smov 0  }
   0xd   :  { %s1950_s13 = smov 0   ;;  %s1952_s14 = smov 0  }
   0xe   :  { %s1954_s15 = smov 0   ;;  %s1956_s16 = smov 0  }
   0xf LB: > { %2591 = sst [smem:[#allocation12_spill]] %s1862_s14  ;;  %s1983_s17 = sadd.s32 4294967295, %s1870_s16   ;;  %s1870_s16 = sphi %s1956_s16, %s27_s16   ;;  %s1866_s15 = sphi %s1954_s15, %s2627_s15   ;;  %s1862_s14 = sphi %s1952_s14, %s2622_s14   ;;  %s1858_s13 = sphi %s1950_s13, %s2626_s13   ;;  %s1854_s12 = sphi %s1948_s12, %s2621_s12   ;;  %s1850_s11 = sphi %s1946_s11, %s2625_s11   ;;  %s1846_s10 = sphi %s1944_s10, %s2624_s10   ;;  %s1842_s30 = sphi %s1942_s30, %s2623_s30  }
  0x10   : > { %s2560_s18 = sadd.s32 4294967294, %s1870_s16   ;;  %s36_s19 = sadd.s32 1, %s1862_s14 }
  0x11   : > { %s39_s20 = sadd.s32 1, %s1866_s15  ;;  %p37_p0 = scmp.ge.s32.totalorder %s36_s19, 2 }
  0x12   : > { %s212_s21 = sadd.s32 1, %s1850_s11  ;;  %p222_p1 = scmp.ne.s32.totalorder %s1850_s11, %s1846_s10 }
  0x13   : > { %p223_p2 = scmp.eq.s32.totalorder %s1983_s17, 3  ;;  %s2629_s19 = smov (%p37_p0, %s36_s19), 0 }
  0x14   : > { %2592 = sst [smem:[#allocation13_spill]] %s2629_s19  ;;  %s2631_s20 = smov (!%p37_p0, %s39_s20), %s1866_s15 }
  0x15   : > { %s208_s22 = ssub.s32 %s1862_s14, %s2629_s19  ;;  %p1997_p3 = por %p223_p2, %p222_p1 }
  0x16   : > { %p41_p4 = scmp.ge.s32.totalorder %s2631_s20, 2  ;;  %p228_p5 = scmp.ne.s32.totalorder %s1846_s10, %s1842_s30 }
  0x17   : > { %p229_p6 = scmp.eq.s32.totalorder %s2560_s18, 3  ;;  %p1463_p7 = scmp.ge.s32.totalorder %s1870_s16, 1 }
  0x18   : > { %s2633_s20 = smov (%p41_p4, %s2631_s20), 0  ;;  %p292_p9 = scmp.lt.s32.totalorder %s1870_s16, 5 }
  0x19   : > { %p2008_p8 = por %p229_p6, %p228_p5  ;;  %s207_s25 = ssub.s32 %s1866_s15, %s2633_s20 }
  0x1a   : > { %s209_s26 = sor.u32 %s208_s22, %s207_s25  ;;  %p2015_p10 = pnand %p1463_p7, %p292_p9 }
  0x1b   : > { %s2594_s24 = scalar_select %p2008_p8, 1, 0 }
  0x1c   : > { %p210_p11 = scmp.eq.s32.totalorder %s209_s26, 0  ;;  %p1558_p12 = scmp.eq.s32.totalorder %s1983_s17, 0 }
  0x1d   : > { %2595 = sst [smem:[#allocation14_spill]] %s2594_s24  ;;  %p1544_p13 = pneg %p2015_p10 }
  0x1e   : > { %s2597_s1 = sld [smem:[#allocation16_spill]]  ;;  %s1872_s14 = smov [#allocation2]  }
  0x1f   : > { %s2026_s19 = scalar_select %p210_p11, %s1850_s11, %s212_s21  }
  0x20   : > { %s305_s24 = sshll.u32 %s1872_s14, 4  ;;  %p1545_p0 = pnand %p1558_p12, %p1544_p13  ;;  %s306_s24 = int_to_ptr.vmem [resolvable:$true] %s305_s24 }
  0x21   : > { %s1873_s22 = smov 128   ;;  %s1874_s25 = smov 8  }
  0x22   : > { %361 = sbr.rel (%p2015_p10) target bundleno = 817 (0x331), region = 48 }
  0x24   : > { %s303_s18 = sshll.u32 %s2597_s1, 4  ;;  %s304_s18 = int_to_ptr.hbm [resolvable:$true] %s303_s18 }
  0x25   : > { %1547 = dma.hbm_to_vmem [thread:$0]  (!%p1545_p0), %s304_s18, 1024, %s306_s24, [#allocation3], %s1873_s22, %s1873_s22, %s1874_s25  }
  0x27   : > { %1829 = dma.done.wait (%p1558_p12), [#allocation3], 1024  }
  0x28   : > { %1831 = vsyncadd (%p1558_p12), [#allocation3], 4294966272  ;;  %s2037_s21 = sshll.u32 %s1854_s12, 1  ;;  %p423_p1 = scmp.lt.s32.totalorder %s1858_s13, 1  ;;  %v1504_v0 = vld [vmem:[#allocation2 + $0x30] sm:$0xf] }
  0x29   : > { %p425_p2 = scmp.lt.s32.totalorder %s2037_s21, 3  ;;  %v1533_v1 = vld [vmem:[#allocation2 + $0x34] sm:$0xf0]  ;;  %v1496_v2 = vld [vmem:[#allocation2 + $0x20] sm:$0xf]  ;;  %s2598_s4 = sld [smem:[#allocation19_spill]] }
  0x2a   : > { %s424_s14 = scalar_select %p423_p1, %s1858_s13, 1  ;;  %v1505_v3 = vor.u32 %v1533_v1, %v1504_v0  ;;  %v1531_v4 = vld [vmem:[#allocation2 + $0x24] sm:$0xf0]  ;;  %v1488_v6 = vld [vmem:[#allocation2 + $0x10] sm:$0xf]  ;;  %vm505_vm0 = vcmask 523264  }
  0x2b   : > { %s2043_s18 = scalar_select %p425_p2, %s2037_s21, 3  ;;  %v1497_v5 = vor.u32 %v1531_v4, %v1496_v2  ;;  %v1529_v7 = vld [vmem:[#allocation2 + $0x14] sm:$0xf0]  ;;  %v1480_v11 = vld [vmem:[#allocation2] sm:$0xf]  ;;  %vm545_vm1 = vcmask 130048  }
  0x2c   : > { %s1472_s24 = sshll.u32 %s424_s14, 2  ;;  %513 = vmatpush.bf16.msra.mxu0 %v1505_v3  ;;  %s2599_s3 = sld [smem:[#allocation18_spill]]  ;;  %v1489_v10 = vor.u32 %v1529_v7, %v1488_v6  ;;  %v1527_v12 = vld [vmem:[#allocation2 + $0x4] sm:$0xf0]  ;;  %v1882_v45 = vmov 16.0  }
  0x2d   : > { %s428_s26 = sadd.s32 %s1472_s24, %s2043_s18  ;;  %s2568_s25 = smov 64   ;;  %v1481_v13 = vor.u32 %v1527_v12, %v1480_v11  ;;  %1647 = vrcp.f32 %v1882_v45 }
  0x2e   : > { %s1473_s12 = sshll.u32 %s428_s26, 3  ;;  %s2600_s0 = sld [smem:[#allocation15_spill]] }
  0x2f   : > { %v1645_v8 = vld [vmem:[%s2598_s4] ss:$0 sm:$0xff]  ;;  %s2566_s1 = smov 16   ;;  %s2564_s27 = smov 80  }
  0x30   : > { %514 = vmatpush.bf16.msra.mxu0 %v1497_v5  ;;  %632 = vrot.lane.b32.xlu0 %v1645_v8, %s2568_s25  ;;  %s2579_s28 = smov 32   ;;  %s2572_s29 = smov 96  }
  0x31   : > { %s2582_s22 = smov 112   ;;  %s2601_s2 = sld [smem:[#allocation17_spill]] }
  0x32   : > { %v2052_v9 = vld [vmem:[%s2599_s3] ss:$0 sm:$0xff]  ;;  %s2573_s14 = smov 8   ;;  %s1885_s24 = smov 56  }
  0x33   : > { %739 = vrot.lane.b32.xlu1 %v2052_v9, %s2566_s1  ;;  %v1648_v46 = vpop.eup %1647  ;;  %s2607_s5 = sld [smem:[#allocation20_spill]]  ;;  %s2608_s3 = smov 112  }
  0x34   : > { %s430_s26 = scalar_lea.vmem %s2600_s0, %s1473_s12  ;;  %515 = vmatpush.bf16.msra.mxu0 %v1489_v10  ;;  %s2576_s12 = smov 48   ;;  %v553_v49 = vmul.f32 16.0, %v1648_v46  ;;  %vm557_vm2 = vweird.f32 %v1648_v46 }
  0x35   : > { %v448_v14 = vld [vmem:[%s430_s26] sm:$0xff]  ;;  %v449_v15 = vld [vmem:[%s430_s26 + $0x8] sm:$0xff]  ;;  %1077 = vrot.lane.b32.xlu2 %v2052_v9, %s2576_s12  ;;  %s2578_s26 = smov 120  }
  0x36   : > { %v2060_v16 = vpack.c.bf16 %v449_v15, %v448_v14  ;;  %v554_v50 = vsub.f32 1.0, %v553_v49 }
  0x37   : > { %v459_v17 = vld [vmem:[%s2601_s2] sm:$0x3] }
  0x38   : > { %516 = vmatpush.bf16.msra.mxu0 %v1481_v13  ;;  %782 = vrot.lane.b32.xlu0 %v1645_v8, %s2564_s27  ;;  %v461_v18 = vperm.slane %v459_v17, 0  ;;  %v555_v53 = vmul.f32 %v1648_v46, %v554_v50 }
  0x3a   : > { %v556_v54 = vadd.f32 %v1648_v46, %v555_v53 }
  0x3b   : > { %908 = vrot.lane.b32.xlu1 %v2052_v9, %s2579_s28  ;;  %1510 = vmatmul.msk.bf16.vlgmr.msra.gmra.mxu0 %vm505_vm0, %v2060_v16 }
  0x3c   : > { %v2119_v57 = vsel %vm557_vm2, %v1648_v46, %v556_v54 }
  0x40   : > { %951 = vrot.lane.b32.xlu0 %v1645_v8, %s2572_s29 }
  0x48   : > { %1120 = vrot.lane.b32.xlu0 %v1645_v8, %s2582_s22 }
  0x8f   : > { %v2126_v14 = vpop.permute.xlu2 %1077 }
  0xa2   : > { %v2097_v27 = vpop.permute.xlu0 %632 }
  0xa5   : > { %v2102_v29 = vpop.permute.xlu1 %739 }
  0xaa   : > { %v2100_v28 = vpop.permute.xlu0 %782 }
  0xad   : > { %v2106_v31 = vpop.permute.xlu1 %908 }
  0xb2   : > { %v2104_v30 = vpop.permute.xlu0 %951 }
  0xb8   : > { %v518_v19 = vpop.f32.mrf.mxu0 }
  0xb9   : > { %v2074_v20 = vadd.f32 %v518_v19, %v461_v18 }
  0xba   : > { %v2108_v32 = vpop.permute.xlu0 %1120 }
  0xbb   : > { %v543_v21 = vmul.f32 %v2074_v20, %v2074_v20 }
  0xbd   : > { %701 = vrot.lane.b32.xlu0 %v543_v21, %s2582_s22  ;;  %592 = vrot.lane.b32.xlu1 %v543_v21, %s2568_s25  ;;  %v546_v25 = vsel %vm545_vm1, %v543_v21, 0.0 }
  0xc0   : > { %v520_v22 = vpop.f32.mrf.mxu0 }
  0xc1   : > { %v2080_v23 = vadd.f32 %v520_v22, %v461_v18 }
  0xc3   : > { %v544_v24 = vmul.f32 %v2080_v23, %v2080_v23 }
  0xc5   : > { %1041 = vrot.lane.b32.xlu2 %v544_v24, %s2564_s27  ;;  %870 = vrot.lane.b32.xlu0 %v543_v21, %s2572_s29  ;;  %v549_v26 = vsel %vm545_vm1, %v544_v24, 0.0 }
  0xc6   : > { %744 = vrot.lane.b32.xlu1 %v543_v21, %s2576_s12 }
  0xce   : > { %913 = vrot.lane.b32.xlu1 %v543_v21, %s2579_s28 }
  0xd6   : > { %1082 = vrot.lane.b32.xlu1 %v543_v21, %s2566_s1 }
  0xde   : > { %1039 = vrot.lane.b32.xlu1 %v543_v21, %s2564_s27  ;;  %s2583_s27 = smov 72  }
  0xe6   : > { %594 = vrot.lane.b32.xlu1 %v544_v24, %s2568_s25 }
  0xee   : > { %703 = vrot.lane.b32.xlu1 %v544_v24, %s2582_s22 }
  0xef   : > { %547 = vadd.xlane.f32.xlu0 %v546_v25 }
  0xf6   : > { %746 = vrot.lane.b32.xlu1 %v544_v24, %s2576_s12 }
  0xf7   : > { %550 = vadd.xlane.f32.xlu0 %v549_v26 }
  0xfe   : > { %872 = vrot.lane.b32.xlu1 %v544_v24, %s2572_s29 }
 0x106   : > { %915 = vrot.lane.b32.xlu1 %v544_v24, %s2579_s28 }
 0x10e   : > { %1084 = vrot.lane.b32.xlu1 %v544_v24, %s2566_s1  ;;  %s2570_s1 = smov 40  }
 0x12f   : > { %v593_v33 = vpop.permute.xlu1 %592  ;;  %v702_v35 = vpop.permute.xlu0 %701 }
 0x130   : > { %v598_v34 = vsel %vm545_vm1, %v593_v33, 0.0  ;;  %v707_v37 = vsel %vm545_vm1, %v702_v35, 0.0  ;;  %v1042_v33 = vpop.permute.xlu2 %1041 }
 0x131   : > { %599 = vadd.xlane.f32.xlu2 %v598_v34  ;;  %v1048_v35 = vsel %vm545_vm1, %v1042_v33, 0.0 }
 0x137   : > { %v871_v39 = vpop.permute.xlu0 %870 }
 0x138   : > { %v745_v36 = vpop.permute.xlu1 %744  ;;  %v876_v41 = vsel %vm545_vm1, %v871_v39, 0.0 }
 0x139   : > { %708 = vadd.xlane.f32.xlu2 %v707_v37  ;;  %v750_v38 = vsel %vm545_vm1, %v745_v36, 0.0 }
 0x13a   : > { %751 = vadd.xlane.f32.xlu1 %v750_v38 }
 0x140   : > { %v914_v40 = vpop.permute.xlu1 %913 }
 0x141   : > { %877 = vadd.xlane.f32.xlu2 %v876_v41  ;;  %v919_v42 = vsel %vm545_vm1, %v914_v40, 0.0 }
 0x142   : > { %920 = vadd.xlane.f32.xlu0 %v919_v42 }
 0x148   : > { %v1083_v43 = vpop.permute.xlu1 %1082 }
 0x149   : > { %v1088_v44 = vsel %vm545_vm1, %v1083_v43, 0.0 }
 0x14a   : > { %1089 = vadd.xlane.f32.xlu0 %v1088_v44 }
 0x150   : > { %v1040_v47 = vpop.permute.xlu1 %1039 }
 0x151   : > { %v1045_v48 = vsel %vm545_vm1, %v1040_v47, 0.0 }
 0x152   : > { %1046 = vadd.xlane.f32.xlu2 %v1045_v48 }
 0x158   : > { %v595_v51 = vpop.permute.xlu1 %594 }
 0x159   : > { %v601_v52 = vsel %vm545_vm1, %v595_v51, 0.0 }
 0x15a   : > { %602 = vadd.xlane.f32.xlu2 %v601_v52 }
 0x160   : > { %v704_v55 = vpop.permute.xlu1 %703 }
 0x161   : > { %v710_v56 = vsel %vm545_vm1, %v704_v55, 0.0 }
 0x162   : > { %711 = vadd.xlane.f32.xlu0 %v710_v56  ;;  %v548_v58 = vpop.xlane.xlu0 %547 }
 0x163   : > { %v559_v59 = vmul.f32 %v2119_v57, %v548_v58 }
 0x165   : > { %v561_v61 = vadd.f32 1.1920929e-07, %v559_v59 }
 0x167   : > { %1649 = vrsqrt.f32 %v561_v61  ;;  %vm569_vm7 = vweird.f32 %v561_v61 }
 0x168   : > { %v747_v60 = vpop.permute.xlu1 %746 }
 0x169   : > { %v753_v62 = vsel %vm545_vm1, %v747_v60, 0.0 }
 0x16a   : > { %754 = vadd.xlane.f32.xlu2 %v753_v62  ;;  %v551_v63 = vpop.xlane.xlu0 %550 }
 0x16b   : > { %v560_v0 = vmul.f32 %v2119_v57, %v551_v63 }
 0x16d   : > { %v562_v1 = vadd.f32 1.1920929e-07, %v560_v0  ;;  %v1650_v4 = vpop.eup %1649 }
 0x16e   : > { %v564_v6 = vmul.f32 %v1650_v4, %v561_v61  ;;  %vm570_vm6 = vweird.f32 %v1650_v4 }
 0x16f   : > { %1651 = vrsqrt.f32 %v562_v1  ;;  %vm579_vm4 = vweird.f32 %v562_v1  ;;  %vm571_vm8 = vmor %vm569_vm7, %vm570_vm6 }
 0x170   : > { %v873_v2 = vpop.permute.xlu1 %872  ;;  %v565_v12 = vmul.f32 %v1650_v4, %v564_v6 }
 0x171   : > { %v879_v3 = vsel %vm545_vm1, %v873_v2, 0.0 }
 0x172   : > { %880 = vadd.xlane.f32.xlu0 %v879_v3  ;;  %v566_v17 = vmul.f32 0.5, %v565_v12 }
 0x174   : > { %v567_v25 = vsub.f32 1.5, %v566_v17 }
 0x175   : > { %v1652_v5 = vpop.eup %1651 }
 0x176   : > { %v574_v7 = vmul.f32 %v1652_v5, %v562_v1  ;;  %vm580_vm3 = vweird.f32 %v1652_v5  ;;  %v568_v34 = vmul.f32 %v1650_v4, %v567_v25 }
 0x177   : > { %vm581_vm5 = vmor %vm579_vm4, %vm580_vm3 }
 0x178   : > { %v575_v8 = vmul.f32 %v1652_v5, %v574_v7  ;;  %v916_v10 = vpop.permute.xlu1 %915  ;;  %v572_v36 = vsel %vm571_vm8, %v1650_v4, %v568_v34 }
 0x179   : > { %v922_v11 = vsel %vm545_vm1, %v916_v10, 0.0  ;;  %v583_v37 = vmul.f32 %v572_v36, %v2074_v20 }
 0x17a   : > { %v576_v13 = vmul.f32 0.5, %v575_v8  ;;  %923 = vadd.xlane.f32.xlu1 %v922_v11 }
 0x17b   : > { %v2138_v38 = vmul.f32 %v2052_v9, %v583_v37 }
 0x17c   : > { %v577_v15 = vsub.f32 1.5, %v576_v13 }
 0x17e   : > { %v578_v18 = vmul.f32 %v1652_v5, %v577_v15 }
 0x180   : > { %v1085_v19 = vpop.permute.xlu1 %1084  ;;  %v582_v21 = vsel %vm581_vm5, %v1652_v5, %v578_v18 }
 0x181   : > { %v1091_v22 = vsel %vm545_vm1, %v1085_v19, 0.0  ;;  %v584_v24 = vmul.f32 %v582_v21, %v2080_v23 }
 0x182   : > { %1092 = vadd.xlane.f32.xlu0 %v1091_v22 }
 0x183   : > { %v2131_v26 = vmul.f32 %v2052_v9, %v584_v24 }
 0x185   : > { %641 = vrot.lane.b32.xlu2 %v2131_v26, %s2578_s26 }
 0x18a   : > { %1049 = vadd.xlane.f32.xlu0 %v1048_v35 }
 0x193   : > { %639 = vrot.lane.b32.xlu1 %v2138_v38, %s2578_s26 }
 0x19b   : > { %645 = vrot.lane.b32.xlu1 %v2138_v38, %s2573_s14 }
 0x1a3   : > { %647 = vrot.lane.b32.xlu1 %v2131_v26, %s2573_s14 }
 0x1a4   : > { %v600_v39 = vpop.xlane.xlu2 %599 }
 0x1a5   : > { %v604_v40 = vmul.f32 %v600_v39, %v2119_v57 }
 0x1a7   : > { %v606_v41 = vadd.f32 1.1920929e-07, %v604_v40 }
 0x1a9   : > { %1653 = vrsqrt.f32 %v606_v41  ;;  %vm614_vm10 = vweird.f32 %v606_v41 }
 0x1ac   : > { %v709_v42 = vpop.xlane.xlu2 %708 }
 0x1ad   : > { %v713_v43 = vmul.f32 %v709_v42, %v2119_v57  ;;  %v752_v9 = vpop.xlane.xlu1 %751 }
 0x1ae   : > { %v756_v44 = vmul.f32 %v752_v9, %v2119_v57 }
 0x1af   : > { %v1654_v45 = vpop.eup %1653  ;;  %v715_v46 = vadd.f32 1.1920929e-07, %v713_v43 }
 0x1b0   : > { %v609_v47 = vmul.f32 %v1654_v45, %v606_v41  ;;  %v758_v48 = vadd.f32 1.1920929e-07, %v756_v44  ;;  %vm615_vm9 = vweird.f32 %v1654_v45 }
 0x1b1   : > { %1655 = vrsqrt.f32 %v715_v46  ;;  %vm616_vm11 = vmor %vm614_vm10, %vm615_vm9  ;;  %vm723_vm14 = vweird.f32 %v715_v46 }
 0x1b2   : > { %v610_v49 = vmul.f32 %v1654_v45, %v609_v47  ;;  %1657 = vrsqrt.f32 %v758_v48  ;;  %vm766_vm1 = vweird.f32 %v758_v48 }
 0x1b4   : > { %v611_v50 = vmul.f32 0.5, %v610_v49  ;;  %v878_v51 = vpop.xlane.xlu2 %877 }
 0x1b5   : > { %v882_v52 = vmul.f32 %v878_v51, %v2119_v57  ;;  %v921_v53 = vpop.xlane.xlu0 %920 }
 0x1b6   : > { %v612_v54 = vsub.f32 1.5, %v611_v50  ;;  %v925_v55 = vmul.f32 %v921_v53, %v2119_v57 }
 0x1b7   : > { %v1656_v56 = vpop.eup %1655  ;;  %v884_v58 = vadd.f32 1.1920929e-07, %v882_v52 }
 0x1b8   : > { %v1658_v59 = vpop.eup %1657  ;;  %v613_v60 = vmul.f32 %v1654_v45, %v612_v54  ;;  %v718_v61 = vmul.f32 %v1656_v56, %v715_v46  ;;  %v2151_v62 = vadd.f32 1.1920929e-07, %v925_v55  ;;  %vm724_vm12 = vweird.f32 %v1656_v56 }
 0x1b9   : > { %v761_v63 = vmul.f32 %v1658_v59, %v758_v48  ;;  %1659 = vrsqrt.f32 %v884_v58  ;;  %vm767_vm13 = vweird.f32 %v1658_v59  ;;  %vm725_vm15 = vmor %vm723_vm14, %vm724_vm12  ;;  %vm892_vm4 = vweird.f32 %v884_v58 }
 0x1ba   : > { %v719_v0 = vmul.f32 %v1656_v56, %v718_v61  ;;  %1661 = vrsqrt.f32 %v2151_v62  ;;  %v617_v1 = vsel %vm616_vm11, %v1654_v45, %v613_v60  ;;  %vm768_vm2 = vmor %vm766_vm1, %vm767_vm13  ;;  %vm935_vm7 = vweird.f32 %v2151_v62 }
 0x1bb   : > { %v762_v2 = vmul.f32 %v1658_v59, %v761_v63  ;;  %v628_v3 = vmul.f32 %v617_v1, %v2074_v20 }
 0x1bc   : > { %v720_v4 = vmul.f32 0.5, %v719_v0 }
 0x1bd   : > { %v763_v5 = vmul.f32 0.5, %v762_v2  ;;  %v1090_v6 = vpop.xlane.xlu0 %1089  ;;  %v635_v7 = vmul.f32 %v2097_v27, %v628_v3 }
 0x1be   : > { %v721_v8 = vsub.f32 1.5, %v720_v4  ;;  %v1094_v10 = vmul.f32 %v1090_v6, %v2119_v57 }
 0x1bf   : > { %v1660_v11 = vpop.eup %1659  ;;  %v764_v12 = vsub.f32 1.5, %v763_v5  ;;  %656 = vrot.lane.b32.xlu0 %v635_v7, %s1885_s24  ;;  %676 = vrot.lane.b32.xlu1 %v635_v7, %s2568_s25  ;;  %s2581_s25 = smov 104  }
 0x1c0   : > { %v2159_v13 = vpop.eup %1661  ;;  %v722_v15 = vmul.f32 %v1656_v56, %v721_v8  ;;  %v887_v17 = vmul.f32 %v1660_v11, %v884_v58  ;;  %v2161_v18 = vadd.f32 1.1920929e-07, %v1094_v10  ;;  %662 = vrot.lane.b32.xlu2 %v635_v7, %s2583_s27  ;;  %vm893_vm3 = vweird.f32 %v1660_v11 }
 0x1c1   : > { %v765_v19 = vmul.f32 %v1658_v59, %v764_v12  ;;  %v930_v21 = vmul.f32 %v2159_v13, %v2151_v62  ;;  %vm894_vm5 = vmor %vm892_vm4, %vm893_vm3  ;;  %vm936_vm6 = vweird.f32 %v2159_v13 }
 0x1c2   : > { %v888_v22 = vmul.f32 %v1660_v11, %v887_v17  ;;  %1663 = vrsqrt.f32 %v2161_v18  ;;  %v726_v24 = vsel %vm725_vm15, %v1656_v56, %v722_v15  ;;  %vm937_vm8 = vmor %vm935_vm7, %vm936_vm6  ;;  %vm1104_vm10 = vweird.f32 %v2161_v18 }
 0x1c3   : > { %v931_v25 = vmul.f32 %v2159_v13, %v930_v21  ;;  %v769_v33 = vsel %vm768_vm2, %v1658_v59, %v765_v19  ;;  %v737_v34 = vmul.f32 %v726_v24, %v2074_v20 }
 0x1c4   : > { %v889_v35 = vmul.f32 0.5, %v888_v22  ;;  %v780_v36 = vmul.f32 %v769_v33, %v2074_v20 }
 0x1c5   : > { %v932_v37 = vmul.f32 0.5, %v931_v25  ;;  %v1047_v39 = vpop.xlane.xlu2 %1046  ;;  %v742_v40 = vmul.f32 %v2102_v29, %v737_v34 }
 0x1c6   : > { %v890_v41 = vsub.f32 1.5, %v889_v35  ;;  %v1051_v42 = vmul.f32 %v1047_v39, %v2119_v57  ;;  %v785_v43 = vmul.f32 %v2100_v28, %v780_v36 }
 0x1c7   : > { %v933_v45 = vsub.f32 1.5, %v932_v37 }
 0x1c8   : > { %v1664_v9 = vpop.eup %1663  ;;  %v891_v44 = vmul.f32 %v1660_v11, %v890_v41  ;;  %v1053_v46 = vadd.f32 1.1920929e-07, %v1051_v42  ;;  %811 = vrot.lane.b32.xlu0 %v785_v43, %s1885_s24  ;;  %805 = vrot.lane.b32.xlu1 %v785_v43, %s2570_s1  ;;  %s2574_s1 = smov 88  }
 0x1c9   : > { %v1099_v47 = vmul.f32 %v1664_v9, %v2161_v18  ;;  %789 = vrot.lane.b32.xlu2 %v742_v40, %s2581_s25  ;;  %v934_v51 = vmul.f32 %v2159_v13, %v933_v45  ;;  %vm1105_vm9 = vweird.f32 %v1664_v9 }
 0x1ca   : > { %1665 = vrsqrt.f32 %v1053_v46  ;;  %v895_v48 = vsel %vm894_vm5, %v1660_v11, %v891_v44  ;;  %vm2191_vm11 = vmor %vm1104_vm10, %vm1105_vm9  ;;  %vm1061_vm13 = vweird.f32 %v1053_v46 }
 0x1cb   : > { %v1100_v49 = vmul.f32 %v1664_v9, %v1099_v47  ;;  %v906_v50 = vmul.f32 %v895_v48, %v2074_v20  ;;  %v938_v60 = vsel %vm937_vm8, %v2159_v13, %v934_v51 }
 0x1cc   : > { %v949_v62 = vmul.f32 %v938_v60, %v2074_v20 }
 0x1cd   : > { %v1101_v52 = vmul.f32 0.5, %v1100_v49  ;;  %v603_v53 = vpop.xlane.xlu2 %602  ;;  %v911_v54 = vmul.f32 %v2106_v31, %v906_v50 }
 0x1ce   : > { %v605_v55 = vmul.f32 %v603_v53, %v2119_v57  ;;  %v954_v4 = vmul.f32 %v2104_v30, %v949_v62 }
 0x1cf   : > { %v1102_v58 = vsub.f32 1.5, %v1101_v52 }
 0x1d0   : > { %v1666_v56 = vpop.eup %1665  ;;  %v607_v59 = vadd.f32 1.1920929e-07, %v605_v55  ;;  %819 = vrot.lane.b32.xlu0 %v742_v40, %s2582_s22  ;;  %958 = vrot.lane.b32.xlu1 %v911_v54, %s2574_s1 }
 0x1d1   : > { %v1056_v61 = vmul.f32 %v1666_v56, %v1053_v46  ;;  %795 = vrot.lane.b32.xlu2 %v742_v40, %s2578_s26  ;;  %v1103_v0 = vmul.f32 %v1664_v9, %v1102_v58  ;;  %vm1062_vm12 = vweird.f32 %v1666_v56  ;;  %s1475_s26 = sshll.u32 %s2043_s18, 3 }
 0x1d2   : > { %1667 = vrsqrt.f32 %v607_v59  ;;  %vm1063_vm14 = vmor %vm1061_vm13, %vm1062_vm12  ;;  %vm624_vm1 = vweird.f32 %v607_v59  ;;  %s442_s18 = scalar_lea.vmem %s2556_s6, %s1475_s26 }
 0x1d3   : > { %v1057_v63 = vmul.f32 %v1666_v56, %v1056_v61  ;;  %v1107_v7 = vsel %vm2191_vm11, %v1664_v9, %v1103_v0 }
 0x1d4   : > { %v1118_v15 = vmul.f32 %v1107_v7, %v2074_v20 }
 0x1d5   : > { %v1058_v1 = vmul.f32 0.5, %v1057_v63  ;;  %v712_v6 = vpop.xlane.xlu0 %711 }
 0x1d6   : > { %v714_v12 = vmul.f32 %v712_v6, %v2119_v57  ;;  %v2211_v33 = vmul.f32 %v2108_v32, %v1118_v15 }
 0x1d7   : > { %v1059_v3 = vsub.f32 1.5, %v1058_v1 }
 0x1d8   : > { %v1668_v5 = vpop.eup %1667  ;;  %831 = vrot.lane.b32.xlu0 %v785_v43, %s2576_s12  ;;  %988 = vrot.lane.b32.xlu1 %v911_v54, %s2572_s29  ;;  %v2208_v25 = vadd.f32 1.1920929e-07, %v714_v12  ;;  %s1890_s29 = smov 24  }
 0x1d9   : > { %v1060_v8 = vmul.f32 %v1666_v56, %v1059_v3  ;;  %v619_v10 = vmul.f32 %v1668_v5, %v607_v59  ;;  %1000 = vrot.lane.b32.xlu2 %v954_v4, %s2579_s28  ;;  %vm625_vm15 = vweird.f32 %v1668_v5  ;;  %s2610_s28 = smov 32  }
 0x1da   : > { %vm626_vm2 = vmor %vm624_vm1, %vm625_vm15  ;;  %vm733_vm10 = vweird.f32 %v2208_v25  ;;  %vm651_vm1 = vcmask 64512  }
 0x1db   : > { %v620_v11 = vmul.f32 %v1668_v5, %v619_v10  ;;  %v1064_v13 = vsel %vm1063_vm14, %v1666_v56, %v1060_v8 }
 0x1dc   : > { %v1075_v17 = vmul.f32 %v1064_v13, %v2074_v20 }
 0x1dd   : > { %v621_v18 = vmul.f32 0.5, %v620_v11  ;;  %v755_v19 = vpop.xlane.xlu2 %754 }
 0x1de   : > { %v757_v21 = vmul.f32 %v755_v19, %v2119_v57  ;;  %v2206_v22 = vmul.f32 %v2126_v14, %v1075_v17 }
 0x1df   : > { %v622_v24 = vsub.f32 1.5, %v621_v18 }
 0x1e0   : > { %v759_v34 = vadd.f32 1.1920929e-07, %v757_v21  ;;  %964 = vrot.lane.b32.xlu0 %v911_v54, %s2581_s25  ;;  %1127 = vrot.lane.b32.xlu1 %v2206_v22, %s2583_s27 }
 0x1e1   : > { %v623_v20 = vmul.f32 %v1668_v5, %v622_v24  ;;  %1143 = vrot.lane.b32.xlu2 %v2211_v33, %s2573_s14  ;;  %s2604_s14 = smov 40  }
 0x1e2   : > { %1669 = vrsqrt.f32 %v759_v34  ;;  %vm776_vm4 = vweird.f32 %v759_v34 }
 0x1e3   : > { %1671 = vrsqrt.f32 %v2208_v25  ;;  %v627_v35 = vsel %vm626_vm2, %v1668_v5, %v623_v20 }
 0x1e4   : > { %v629_v36 = vmul.f32 %v627_v35, %v2080_v23 }
 0x1e5   : > { %v881_v37 = vpop.xlane.xlu0 %880 }
 0x1e6   : > { %v883_v39 = vmul.f32 %v881_v37, %v2119_v57  ;;  %v2222_v40 = vmul.f32 %v2097_v27, %v629_v36 }
 0x1e8   : > { %v1670_v41 = vpop.eup %1669  ;;  %v885_v42 = vadd.f32 1.1920929e-07, %v883_v39  ;;  %658 = vrot.lane.b32.xlu1 %v2222_v40, %s1885_s24  ;;  %974 = vrot.lane.b32.xlu0 %v954_v4, %s1890_s29 }
 0x1e9   : > { %v2227_v43 = vpop.eup %1671  ;;  %v771_v9 = vmul.f32 %v1670_v41, %v759_v34  ;;  %1133 = vrot.lane.b32.xlu2 %v2206_v22, %s2574_s1  ;;  %vm777_vm3 = vweird.f32 %v1670_v41  ;;  %s2605_s1 = smov 64  }
 0x1ea   : > { %1673 = vrsqrt.f32 %v885_v42  ;;  %v728_v27 = vmul.f32 %v2227_v43, %v2208_v25  ;;  %vm778_vm5 = vmor %vm776_vm4, %vm777_vm3  ;;  %vm902_vm7 = vweird.f32 %v885_v42  ;;  %vm734_vm9 = vweird.f32 %v2227_v43 }
 0x1eb   : > { %v772_v44 = vmul.f32 %v1670_v41, %v771_v9  ;;  %vm735_vm11 = vmor %vm733_vm10, %vm734_vm9  ;;  %vm690_vm4 = vcmask 125952   ;;  %vm1191_vm9 = vcmask 519552  }
 0x1ec   : > { %v729_v50 = vmul.f32 %v2227_v43, %v728_v27 }
 0x1ed   : > { %v773_v45 = vmul.f32 0.5, %v772_v44  ;;  %v924_v46 = vpop.xlane.xlu1 %923 }
 0x1ee   : > { %v926_v47 = vmul.f32 %v924_v46, %v2119_v57  ;;  %v730_v56 = vmul.f32 0.5, %v729_v50 }
 0x1ef   : > { %v774_v48 = vsub.f32 1.5, %v773_v45 }
 0x1f0   : > { %v1674_v49 = vpop.eup %1673  ;;  %v928_v51 = vadd.f32 1.1920929e-07, %v926_v47  ;;  %980 = vrot.lane.b32.xlu0 %v954_v4, %s2604_s14  ;;  %v731_v1 = vsub.f32 1.5, %v730_v56 }
 0x1f1   : > { %v775_v52 = vmul.f32 %v1670_v41, %v774_v48  ;;  %v897_v53 = vmul.f32 %v1674_v49, %v885_v42  ;;  %678 = vrot.lane.b32.xlu2 %v2222_v40, %s2605_s1  ;;  %vm903_vm6 = vweird.f32 %v1674_v49 }
 0x1f2   : > { %1675 = vrsqrt.f32 %v928_v51  ;;  %vm904_vm8 = vmor %vm902_vm7, %vm903_vm6  ;;  %vm945_vm13 = vweird.f32 %v928_v51 }
 0x1f3   : > { %v898_v54 = vmul.f32 %v1674_v49, %v897_v53  ;;  %v779_v55 = vsel %vm778_vm5, %v1670_v41, %v775_v52  ;;  %v642_v52 = vpop.permute.xlu2 %641 }
 0x1f4   : > { %v781_v58 = vmul.f32 %v779_v55, %v2080_v23 }
 0x1f5   : > { %v899_v59 = vmul.f32 0.5, %v898_v54  ;;  %v1093_v60 = vpop.xlane.xlu0 %1092 }
 0x1f6   : > { %v1095_v61 = vmul.f32 %v1093_v60, %v2119_v57  ;;  %v786_v63 = vmul.f32 %v2100_v28, %v781_v58  ;;  %v732_v28 = vmul.f32 %v2227_v43, %v731_v1 }
 0x1f7   : > { %v900_v62 = vsub.f32 1.5, %v899_v59 }
 0x1f8   : > { %v1676_v0 = vpop.eup %1675  ;;  %v1097_v2 = vadd.f32 1.1920929e-07, %v1095_v61  ;;  %833 = vrot.lane.b32.xlu1 %v786_v63, %s2576_s12  ;;  %1149 = vrot.lane.b32.xlu0 %v2211_v33, %s1890_s29  ;;  %s2606_s12 = smov 16   ;;  %v736_v18 = vsel %vm735_vm11, %v2227_v43, %v732_v28 }
 0x1f9   : > { %v901_v3 = vmul.f32 %v1674_v49, %v900_v62  ;;  %v940_v4 = vmul.f32 %v1676_v0, %v928_v51  ;;  %807 = vrot.lane.b32.xlu2 %v786_v63, %s2604_s14  ;;  %vm946_vm12 = vweird.f32 %v1676_v0  ;;  %v738_v21 = vmul.f32 %v736_v18, %v2080_v23  ;;  %v2293_v51 = vld [vmem:[%s442_s18 + $0x8] sm:$0xff] }
 0x1fa   : > { %1677 = vrsqrt.f32 %v1097_v2  ;;  %vm947_vm14 = vmor %vm945_vm13, %vm946_vm12  ;;  %vm1114_vm2 = vweird.f32 %v1097_v2 }
 0x1fb   : > { %v941_v5 = vmul.f32 %v1676_v0, %v940_v4  ;;  %v905_v6 = vsel %vm904_vm8, %v1674_v49, %v901_v3  ;;  %v743_v36 = vmul.f32 %v2102_v29, %v738_v21  ;;  %vm1022_vm8 = vcmask 388352  }
 0x1fc   : > { %v907_v7 = vmul.f32 %v905_v6, %v2080_v23 }
 0x1fd   : > { %v942_v8 = vmul.f32 0.5, %v941_v5  ;;  %v1050_v10 = vpop.xlane.xlu0 %1049 }
 0x1fe   : > { %v1052_v11 = vmul.f32 %v1050_v10, %v2119_v57  ;;  %v2251_v12 = vmul.f32 %v2106_v31, %v907_v7 }
 0x1ff   : > { %v943_v13 = vsub.f32 1.5, %v942_v8 }
 0x200   : > { %v1678_v15 = vpop.eup %1677  ;;  %v1054_v17 = vadd.f32 1.1920929e-07, %v1052_v11  ;;  %1169 = vrot.lane.b32.xlu0 %v2211_v33, %s2606_s12  ;;  %966 = vrot.lane.b32.xlu1 %v2251_v12, %s2581_s25  ;;  %s436_s25 = scalar_lea.vmem %s2607_s5, %s1475_s26  ;;  %s2612_s26 = smov 8  }
 0x201   : > { %v944_v19 = vmul.f32 %v1676_v0, %v943_v13  ;;  %v1109_v57 = vmul.f32 %v1678_v15, %v1097_v2  ;;  %813 = vrot.lane.b32.xlu2 %v786_v63, %s1885_s24  ;;  %vm1115_vm15 = vweird.f32 %v1678_v15  ;;  %v2274_v41 = vld [vmem:[%s436_s25] sm:$0xff]  ;;  %v2291_v50 = vld [vmem:[%s436_s25 + $0x8] sm:$0xff]  ;;  %s2611_s25 = smov 120   ;;  %s2614_s24 = smov 96  }
 0x202   : > { %1679 = vrsqrt.f32 %v1054_v17  ;;  %vm1116_vm3 = vmor %vm1114_vm2, %vm1115_vm15  ;;  %v670_v27 = vmul.f32 %v2138_v38, %v2274_v41  ;;  %vm1071_vm6 = vweird.f32 %v1054_v17  ;;  %v671_v56 = vmul.f32 %v2131_v26, %v2291_v50 }
 0x203   : > { %v1110_v31 = vmul.f32 %v1678_v15, %v1109_v57  ;;  %v948_v24 = vsel %vm947_vm14, %v1676_v0, %v944_v19 }
 0x204   : > { %v950_v25 = vmul.f32 %v948_v24, %v2080_v23  ;;  %v1532_v24 = vld [vmem:[#allocation2 + $0x34] sm:$0xf] }
 0x205   : > { %v1111_v34 = vmul.f32 0.5, %v1110_v31  ;;  %v640_v33 = vpop.permute.xlu1 %639 }
 0x206   : > { %v955_v20 = vmul.f32 %v2104_v30, %v950_v25  ;;  %v1506_v25 = vld [vmem:[#allocation2 + $0x38] sm:$0xf0] }
 0x207   : > { %v1112_v35 = vsub.f32 1.5, %v1111_v34 }
 0x208   : > { %v1680_v37 = vpop.eup %1679  ;;  %664 = vrot.lane.b32.xlu0 %v2222_v40, %s2583_s27  ;;  %976 = vrot.lane.b32.xlu1 %v955_v20, %s1890_s29  ;;  %v2276_v40 = vld [vmem:[%s442_s18] sm:$0xff]  ;;  %s2584_s27 = sand.u32 1, %s1846_s10   ;;  %s2616_s18 = smov 72  }
 0x209   : > { %v1066_v39 = vmul.f32 %v1680_v37, %v1054_v17  ;;  %821 = vrot.lane.b32.xlu2 %v743_v36, %s2608_s3  ;;  %v1113_v30 = vmul.f32 %v1678_v15, %v1112_v35  ;;  %s2285_s0 = sshll.u32 %s2584_s27, 3  ;;  %s2609_s3 = smov 104   ;;  %vm1072_vm5 = vweird.f32 %v1680_v37 }
 0x20a   : > { %s2296_s22 = scalar_lea.vmem [#allocation5], %s2285_s0  ;;  %vm1073_vm7 = vmor %vm1071_vm6, %vm1072_vm5 }
 0x20b   : > { %v1067_v29 = vmul.f32 %v1680_v37, %v1066_v39  ;;  %v1117_v46 = vsel %vm1116_vm3, %v1678_v15, %v1113_v30  ;;  %s1233_s4 = sshll.u32 %s2296_s22, 4  ;;  %s2456_s4 = int_to_ptr.vmem [resolvable:$true] %s1233_s4 }
 0x20c   : > { %v1119_v48 = vmul.f32 %v1117_v46, %v2080_v23 }
 0x20d   : > { %v1068_v42 = vmul.f32 0.5, %v1067_v29  ;;  %v646_v43 = vpop.permute.xlu1 %645 }
 0x20e   : > { %v652_v9 = vsel %vm651_vm1, %v640_v33, %v646_v43  ;;  %v1124_v55 = vmul.f32 %v2108_v32, %v1119_v48  ;;  %v1509_v33 = vor.u32 %v1532_v24, %v1506_v25  ;;  %v1526_v48 = vld [vmem:[#allocation2 + $0x4] sm:$0xf] }
 0x20f   : > { %v1069_v44 = vsub.f32 1.5, %v1068_v42  ;;  %v672_v45 = vmul.f32 %v652_v9, %v2276_v40  ;;  %v1528_v9 = vld [vmem:[#allocation2 + $0x14] sm:$0xf] }
 0x210   : > { %791 = vrot.lane.b32.xlu0 %v743_v36, %s2609_s3  ;;  %1002 = vrot.lane.b32.xlu1 %v955_v20, %s2610_s28  ;;  %s2326_s3 = scalar_lea.vmem [#allocation6], %s2285_s0 }
 0x211   : > { %v674_v47 = vadd.f32 %v672_v45, %v670_v27  ;;  %982 = vrot.lane.b32.xlu2 %v955_v20, %s2604_s14  ;;  %v1070_v49 = vmul.f32 %v1680_v37, %v1069_v44  ;;  %s2613_s14 = smov 88   ;;  %527 = vmatpush.bf16.msra.mxu1 %v1509_v33  ;;  %v1490_v44 = vld [vmem:[#allocation2 + $0x18] sm:$0xf0] }
 0x212   : > { %v1493_v45 = vor.u32 %v1528_v9, %v1490_v44 }
 0x213   : > { %v688_v38 = vpack.c.bf16 %v674_v47, %v674_v47  ;;  %v1074_v59 = vsel %vm1073_vm7, %v1680_v37, %v1070_v49  ;;  %v1498_v37 = vld [vmem:[#allocation2 + $0x28] sm:$0xf0] }
 0x214   : > { %v1076_v61 = vmul.f32 %v1074_v59, %v2080_v23  ;;  %v1482_v49 = vld [vmem:[#allocation2 + $0x8] sm:$0xf0] }
 0x215   : > { %v648_v53 = vpop.permute.xlu1 %647  ;;  %691 = vst.msk [vmem:[%s2296_s22] sm:$0xf] %vm690_vm4, %v688_v38 }
 0x216   : > { %v653_v54 = vsel %vm651_vm1, %v642_v52, %v648_v53  ;;  %v1081_v32 = vmul.f32 %v2126_v14, %v1076_v61  ;;  %v1485_v52 = vor.u32 %v1526_v48, %v1482_v49 }
 0x217   : > { %v673_v58 = vmul.f32 %v653_v54, %v2293_v51 }
 0x218   : > { %797 = vrot.lane.b32.xlu0 %v743_v36, %s2611_s25  ;;  %1145 = vrot.lane.b32.xlu1 %v1124_v55, %s2612_s26  ;;  %v1530_v36 = vld [vmem:[#allocation2 + $0x24] sm:$0xf]  ;;  %s2617_s25 = smov 48  }
 0x219   : > { %v675_v60 = vadd.f32 %v673_v58, %v671_v56  ;;  %1151 = vrot.lane.b32.xlu2 %v1124_v55, %s1890_s29  ;;  %s2615_s29 = smov 80   ;;  %v1501_v30 = vor.u32 %v1530_v36, %v1498_v37 }
 0x21a   : > { %v663_v62 = vpop.permute.xlu2 %662 }
 0x21b   : > { %v689_v63 = vpack.c.bf16 %v675_v60, %v675_v60  ;;  %528 = vmatpush.bf16.msra.mxu1 %v1501_v30 }
 0x21d   : > { %692 = vst.msk [vmem:[%s2296_s22 + $0x4] sm:$0xf] %vm690_vm4, %v689_v63 }
 0x21f   : > { %529 = vmatpush.bf16.msra.mxu1 %v1493_v45 }
 0x220   : > { %960 = vrot.lane.b32.xlu0 %v2251_v12, %s2613_s14  ;;  %1135 = vrot.lane.b32.xlu1 %v1081_v32, %s2613_s14 }
 0x221   : > { %1171 = vrot.lane.b32.xlu2 %v1124_v55, %s2606_s12 }
 0x223   : > { %v790_v23 = vpop.permute.xlu2 %789  ;;  %530 = vmatpush.bf16.msra.mxu1 %v1485_v52 }
 0x226   : > { %1511 = vmatmul.msk.bf16.vlgmr.msra.gmra.mxu1 %vm505_vm0, %v2060_v16  ;;  %vm853_vm0 = vcmask 257152  }
 0x228   : > { %990 = vrot.lane.b32.xlu0 %v2251_v12, %s2614_s24  ;;  %1157 = vrot.lane.b32.xlu1 %v2206_v22, %s2615_s29 }
 0x22b   : > { %v796_v2 = vpop.permute.xlu2 %795 }
 0x22c   : > { %v801_v7 = vsel %vm651_vm1, %v790_v23, %v796_v2 }
 0x22d   : > { %v827_v10 = vmul.f32 %v801_v7, %v2276_v40 }
 0x230   : > { %1129 = vrot.lane.b32.xlu0 %v1081_v32, %s2616_s18 }
 0x231   : > { %v677_v26 = vpop.permute.xlu1 %676  ;;  %v657_v14 = vpop.permute.xlu0 %656 }
 0x232   : > { %v682_v0 = vmul.f32 %v677_v26, %v2274_v41  ;;  %v668_v1 = vsel %vm651_vm1, %v657_v14, %v663_v62 }
 0x233   : > { %v684_v3 = vmul.f32 %v668_v1, %v2276_v40  ;;  %v1001_v28 = vpop.permute.xlu2 %1000 }
 0x234   : > { %v1006_v58 = vmul.f32 %v1001_v28, %v2274_v41 }
 0x235   : > { %v686_v4 = vadd.f32 %v684_v3, %v682_v0 }
 0x237   : > { %v693_v5 = vpack.c.bf16 %v686_v4, %v686_v4 }
 0x238   : > { %1159 = vrot.lane.b32.xlu0 %v1081_v32, %s2615_s29  ;;  %s1252_s29 = sshll.u32 %s2326_s3, 4  ;;  %s2450_s29 = int_to_ptr.vmem [resolvable:$true] %s1252_s29 }
 0x239   : > { %695 = vst.msk [vmem:[%s2326_s3] sm:$0xf] %vm690_vm4, %v693_v5 }
 0x23a   : > { %v806_v22 = vpop.permute.xlu1 %805  ;;  %v812_v6 = vpop.permute.xlu0 %811 }
 0x23b   : > { %v1144_v15 = vpop.permute.xlu2 %1143  ;;  %v817_v18 = vsel %vm651_vm1, %v806_v22, %v812_v6 }
 0x23c   : > { %v839_v57 = vmul.f32 %v817_v18, %v2276_v40 }
 0x242   : > { %v820_v8 = vpop.permute.xlu0 %819  ;;  %v959_v12 = vpop.permute.xlu1 %958 }
 0x243   : > { %v825_v11 = vmul.f32 %v820_v8, %v2274_v41  ;;  %v2337_v35 = vpop.permute.xlu2 %1133 }
 0x245   : > { %v829_v13 = vadd.f32 %v827_v10, %v825_v11 }
 0x247   : > { %v843_v17 = vpack.c.bf16 %v829_v13, %v829_v13 }
 0x249   : > { %847 = vrot.lane.b32.xlu2 %v843_v17, %s2606_s12 }
 0x24a   : > { %v832_v19 = vpop.permute.xlu0 %831  ;;  %v989_v34 = vpop.permute.xlu1 %988 }
 0x24b   : > { %v837_v31 = vmul.f32 %v832_v19, %v2274_v41  ;;  %v994_v42 = vmul.f32 %v989_v34, %v2274_v41  ;;  %v679_v53 = vpop.permute.xlu2 %678 }
 0x24c   : > { %v683_v28 = vmul.f32 %v679_v53, %v2291_v50 }
 0x24d   : > { %v841_v21 = vadd.f32 %v839_v57, %v837_v31 }
 0x24f   : > { %v856_v20 = vpack.c.bf16 %v841_v21, %v841_v21 }
 0x251   : > { %860 = vrot.lane.b32.xlu1 %v856_v20, %s2606_s12 }
 0x252   : > { %v965_v39 = vpop.permute.xlu0 %964  ;;  %v1128_v46 = vpop.permute.xlu1 %1127 }
 0x253   : > { %v970_v29 = vsel %vm651_vm1, %v959_v12, %v965_v39  ;;  %v808_v60 = vpop.permute.xlu2 %807 }
 0x254   : > { %v996_v43 = vmul.f32 %v970_v29, %v2276_v40  ;;  %v1139_v29 = vsel %vm651_vm1, %v1128_v46, %v2337_v35 }
 0x255   : > { %v1165_v45 = vmul.f32 %v1139_v29, %v2276_v40 }
 0x256   : > { %v998_v27 = vadd.f32 %v996_v43, %v994_v42 }
 0x258   : > { %v1012_v47 = vpack.c.bf16 %v998_v27, %v998_v27 }
 0x25a   : > { %1016 = vrot.lane.b32.xlu0 %v1012_v47, %s2610_s28  ;;  %v975_v38 = vpop.permute.xlu0 %974  ;;  %v659_v54 = vpop.permute.xlu1 %658 }
 0x25b   : > { %v814_v23 = vpop.permute.xlu2 %813 }
 0x262   : > { %v981_v55 = vpop.permute.xlu0 %980 }
 0x263   : > { %v986_v56 = vsel %vm651_vm1, %v975_v38, %v981_v55  ;;  %v822_v4 = vpop.permute.xlu2 %821  ;;  %v818_v38 = vsel %vm651_vm1, %v808_v60, %v814_v23 }
 0x264   : > { %v1008_v59 = vmul.f32 %v986_v56, %v2276_v40  ;;  %v826_v19 = vmul.f32 %v822_v4, %v2291_v50  ;;  %v840_v53 = vmul.f32 %v818_v38, %v2293_v51 }
 0x266   : > { %v1010_v61 = vadd.f32 %v1008_v59, %v1006_v58 }
 0x268   : > { %v1025_v63 = vpack.c.bf16 %v1010_v61, %v1010_v61 }
 0x26a   : > { %v834_v32 = vpop.permute.xlu1 %833  ;;  %1029 = vrot.lane.b32.xlu1 %v1025_v63, %s2610_s28  ;;  %v1150_v62 = vpop.permute.xlu0 %1149 }
 0x26b   : > { %v1155_v26 = vsel %vm651_vm1, %v1144_v15, %v1150_v62  ;;  %v983_v13 = vpop.permute.xlu2 %982  ;;  %v838_v35 = vmul.f32 %v834_v32, %v2291_v50 }
 0x26c   : > { %v1177_v0 = vmul.f32 %v1155_v26, %v2276_v40 }
 0x26d   : > { %v842_v55 = vadd.f32 %v840_v53, %v838_v35 }
 0x26f   : > { %v857_v56 = vpack.c.bf16 %v842_v55, %v842_v55 }
 0x272   : > { %v967_v14 = vpop.permute.xlu1 %966  ;;  %v1170_v16 = vpop.permute.xlu0 %1169 }
 0x273   : > { %v1175_v1 = vmul.f32 %v1170_v16, %v2274_v41  ;;  %v1152_v31 = vpop.permute.xlu2 %1151 }
 0x275   : > { %v1179_v2 = vadd.f32 %v1177_v0, %v1175_v1 }
 0x277   : > { %v1194_v3 = vpack.c.bf16 %v1179_v2, %v1179_v2 }
 0x279   : > { %1198 = vrot.lane.b32.xlu1 %v1194_v3, %s2617_s25 }
 0x27a   : > { %v977_v5 = vpop.permute.xlu1 %976  ;;  %v665_v22 = vpop.permute.xlu0 %664 }
 0x27b   : > { %v669_v6 = vsel %vm651_vm1, %v659_v54, %v665_v22  ;;  %v987_v24 = vsel %vm651_vm1, %v977_v5, %v983_v13  ;;  %v1172_v30 = vpop.permute.xlu2 %1171 }
 0x27c   : > { %v685_v7 = vmul.f32 %v669_v6, %v2293_v51  ;;  %v1009_v33 = vmul.f32 %v987_v24, %v2293_v51  ;;  %v1176_v9 = vmul.f32 %v1172_v30, %v2291_v50 }
 0x27e   : > { %v687_v8 = vadd.f32 %v685_v7, %v683_v28 }
 0x280   : > { %v694_v10 = vpack.c.bf16 %v687_v8, %v687_v8 }
 0x282   : > { %v1003_v11 = vpop.permute.xlu1 %1002  ;;  %v792_v12 = vpop.permute.xlu0 %791  ;;  %696 = vst.msk [vmem:[%s2326_s3 + $0x4] sm:$0xf] %vm690_vm4, %v694_v10 }
 0x283   : > { %v1007_v25 = vmul.f32 %v1003_v11, %v2291_v50 }
 0x285   : > { %v1011_v37 = vadd.f32 %v1009_v33, %v1007_v25 }
 0x287   : > { %v1026_v42 = vpack.c.bf16 %v1011_v37, %v1011_v37 }
 0x28a   : > { %v1146_v15 = vpop.permute.xlu1 %1145  ;;  %v798_v17 = vpop.permute.xlu0 %797 }
 0x28b   : > { %v802_v18 = vsel %vm651_vm1, %v792_v12, %v798_v17  ;;  %v1156_v39 = vsel %vm651_vm1, %v1146_v15, %v1152_v31 }
 0x28c   : > { %v828_v57 = vmul.f32 %v802_v18, %v2293_v51  ;;  %v1178_v43 = vmul.f32 %v1156_v39, %v2293_v51 }
 0x28e   : > { %v830_v21 = vadd.f32 %v828_v57, %v826_v19  ;;  %v1180_v48 = vadd.f32 %v1178_v43, %v1176_v9 }
 0x290   : > { %v844_v34 = vpack.c.bf16 %v830_v21, %v830_v21  ;;  %v1195_v52 = vpack.c.bf16 %v1180_v48, %v1180_v48 }
 0x292   : > { %v1136_v20 = vpop.permute.xlu1 %1135  ;;  %849 = vrot.lane.b32.xlu0 %v844_v34, %s2606_s12  ;;  %v961_v36 = vpop.permute.xlu0 %960 }
 0x29a   : > { %v1158_v44 = vpop.permute.xlu1 %1157  ;;  %1031 = vrot.lane.b32.xlu0 %v1026_v42, %s2610_s28  ;;  %v991_v27 = vpop.permute.xlu0 %990 }
 0x29b   : > { %v1163_v47 = vmul.f32 %v1158_v44, %v2274_v41  ;;  %v971_v41 = vsel %vm651_vm1, %v961_v36, %v967_v14  ;;  %v995_v58 = vmul.f32 %v991_v27, %v2291_v50 }
 0x29c   : > { %v997_v59 = vmul.f32 %v971_v41, %v2293_v51 }
 0x29d   : > { %v1167_v49 = vadd.f32 %v1165_v45, %v1163_v47 }
 0x29e   : > { %v999_v60 = vadd.f32 %v997_v59, %v995_v58 }
 0x29f   : > { %v1181_v46 = vpack.c.bf16 %v1167_v49, %v1167_v49 }
 0x2a0   : > { %v1013_v32 = vpack.c.bf16 %v999_v60, %v999_v60 }
 0x2a1   : > { %1185 = vrot.lane.b32.xlu2 %v1181_v46, %s2617_s25 }
 0x2a2   : > { %1200 = vrot.lane.b32.xlu0 %v1195_v52, %s2617_s25  ;;  %v1130_v54 = vpop.permute.xlu0 %1129 }
 0x2a3   : > { %v848_v40 = vpop.permute.xlu2 %847  ;;  %v1140_v63 = vsel %vm651_vm1, %v1130_v54, %v1136_v20  ;;  %v532_v2 = vpop.f32.mrf.mxu1 }
 0x2a4   : > { %854 = vst.msk [vmem:[%s2296_s22] sm:$0xf] %vm853_vm0, %v848_v40  ;;  %v1166_v23 = vmul.f32 %v1140_v63, %v2293_v51 }
 0x2a9   : > { %862 = vrot.lane.b32.xlu2 %v857_v56, %s2606_s12 }
 0x2aa   : > { %v1160_v61 = vpop.permute.xlu0 %1159 }
 0x2ab   : > { %v1164_v62 = vmul.f32 %v1160_v61, %v2291_v50  ;;  %v1681_v50 = vld [vmem:[%s2601_s2] sm:$0x3]  ;;  %v534_v5 = vpop.f32.mrf.mxu1 }
 0x2ac   : > { %v462_v1 = vperm.slane %v1681_v50, 1 }
 0x2ad   : > { %v1168_v26 = vadd.f32 %v1166_v23, %v1164_v62 }
 0x2ae   : > { %v533_v3 = vadd.f32 %v532_v2, %v462_v1  ;;  %v535_v22 = vadd.f32 %v534_v5, %v462_v1 }
 0x2af   : > { %v1182_v14 = vpack.c.bf16 %v1168_v26, %v1168_v26 }
 0x2b0   : > { %v697_v4 = vpack.c.bf16 %v533_v3, %v533_v3  ;;  %v698_v6 = vpack.c.bf16 %v535_v22, %v535_v22 }
 0x2b1   : > { %1018 = vrot.lane.b32.xlu2 %v1013_v32, %s2610_s28  ;;  %s2400_s28 = scalar_lea.vmem [#allocation8], %s2285_s0  ;;  %s1516_s0 = sshll.u32 %s1858_s13, 2 }
 0x2b2   : > { %699 = vst.msk [vmem:[%s2400_s28] sm:$0xf] %vm690_vm4, %v697_v4  ;;  %s1230_s14 = sadd.s32 %s1516_s0, %s2037_s21  ;;  %s1213_s21 = sand.u32 1, %s1983_s17  }
 0x2b3   : > { %868 = vst.msk [vmem:[%s2400_s28] sm:$0xf] %vm853_vm0, %v697_v4  ;;  %s1517_s24 = sshll.u32 %s1230_s14, 2  ;;  %s1271_s17 = sshll.u32 %s2400_s28, 4  ;;  %s2462_s17 = int_to_ptr.vmem [resolvable:$true] %s1271_s17 }
 0x2b4   : > { %1037 = vst.msk [vmem:[%s2400_s28] sm:$0xf] %vm1022_vm8, %v697_v4  ;;  %s1251_s26 = scalar_lea.hbm %s2558_s8, %s1517_s24  ;;  %s1232_s14 = scalar_lea.hbm %s2557_s7, %s1517_s24 }
 0x2b5   : > { %1206 = vst.msk [vmem:[%s2400_s28] sm:$0xf] %vm1191_vm9, %v697_v4  ;;  %s2445_s18 = sshll.u32 %s1251_s26, 4  ;;  %s2448_s5 = sshll.u32 %s1232_s14, 4  ;;  %s1255_s18 = int_to_ptr.hbm [resolvable:$true] %s2445_s18  ;;  %s1236_s5 = int_to_ptr.hbm [resolvable:$true] %s2448_s5 }
 0x2b6   : > { %700 = vst.msk [vmem:[%s2400_s28 + $0x4] sm:$0xf] %vm690_vm4, %v698_v6  ;;  %s2464_s27 = scalar_lea.sflag [#allocation7], %s1213_s21  ;;  %s1732_s13 = scalar_lea.hbm %s2558_s8, 32 }
 0x2b7   : > { %869 = vst.msk [vmem:[%s2400_s28 + $0x4] sm:$0xf] %vm853_vm0, %v698_v6 }
 0x2b8   : > { %1038 = vst.msk [vmem:[%s2400_s28 + $0x4] sm:$0xf] %vm1022_vm8, %v698_v6 }
 0x2b9   : > { %1187 = vrot.lane.b32.xlu2 %v1182_v14, %s2617_s25  ;;  %1207 = vst.msk [vmem:[%s2400_s28 + $0x4] sm:$0xf] %vm1191_vm9, %v698_v6  ;;  %s1270_s25 = scalar_lea.hbm %s2559_s9, %s1517_s24  ;;  %s1726_s24 = sshra.s32 %s1255_s18, 4  ;;  %s1727_s24 = int_to_ptr.hbm [resolvable:$true] %s1726_s24 }
 0x2ba   : > { %s2442_s2 = sshll.u32 %s1270_s25, 4  ;;  %s1728_s25 = scalar_lea.hbm %s1727_s24, 8  ;;  %s1274_s2 = int_to_ptr.hbm [resolvable:$true] %s2442_s2 }
 0x2bb   : > { %p1729_p4 = scmp.ne.s32.totalorder %s1727_s24, %s1728_s25  ;;  %p1733_p7 = scmp.lt.s32.totalorder %s1727_s24, %s2558_s8 }
 0x2bc   : > { %p1734_p9 = scmp.lt.s32.totalorder %s1732_s13, %s1728_s25 }
 0x2bd   : > { %p1730_p5 = pnand %p1729_p4, %p1997_p3 }
 0x2be   : > { %p1735_p10 = por %p1734_p9, %p1733_p7 }
 0x2bf   : > { %p1731_p6 = pneg %p1730_p5 }
 0x2c1   : > { %p1736_p11 = pnand %p1735_p10, %p1731_p6 }
 0x2c3   : > { %v861_v16 = vpop.permute.xlu1 %860 }
 0x2c4   : > { %866 = vst.msk [vmem:[%s2326_s3] sm:$0xf] %vm853_vm0, %v861_v16 }
 0x2cc   : > { %v1017_v0 = vpop.permute.xlu0 %1016 }
 0x2cd   : > { %1023 = vst.msk [vmem:[%s2296_s22] sm:$0xf] %vm1022_vm8, %v1017_v0 }
 0x2dc   : > { %v1030_v51 = vpop.permute.xlu1 %1029 }
 0x2dd   : > { %1035 = vst.msk [vmem:[%s2326_s3] sm:$0xf] %vm1022_vm8, %v1030_v51 }
 0x2eb   : > { %v1199_v28 = vpop.permute.xlu1 %1198 }
 0x2ec   : > { %1204 = vst.msk [vmem:[%s2326_s3] sm:$0xf] %vm1191_vm9, %v1199_v28 }
 0x2fb   : > { %v1186_v7 = vpop.permute.xlu2 %1185 }
 0x2fc   : > { %1192 = vst.msk [vmem:[%s2296_s22] sm:$0xf] %vm1191_vm9, %v1186_v7 }
 0x303   : > { %v863_v8 = vpop.permute.xlu2 %862 }
 0x304   : > { %867 = vst.msk [vmem:[%s2326_s3 + $0x4] sm:$0xf] %vm853_vm0, %v863_v8  ;;  %v850_v10 = vpop.permute.xlu0 %849 }
 0x305   : > { %855 = vst.msk [vmem:[%s2296_s22 + $0x4] sm:$0xf] %vm853_vm0, %v850_v10 }
 0x30b   : > { %v1019_v11 = vpop.permute.xlu2 %1018 }
 0x30c   : > { %1024 = vst.msk [vmem:[%s2296_s22 + $0x4] sm:$0xf] %vm1022_vm8, %v1019_v11  ;;  %v1032_v12 = vpop.permute.xlu0 %1031 }
 0x30d   : > { %1036 = vst.msk [vmem:[%s2326_s3 + $0x4] sm:$0xf] %vm1022_vm8, %v1032_v12 }
 0x313   : > { %v1188_v13 = vpop.permute.xlu2 %1187 }
 0x314   : > { %1193 = vst.msk [vmem:[%s2296_s22 + $0x4] sm:$0xf] %vm1191_vm9, %v1188_v13  ;;  %v1201_v15 = vpop.permute.xlu0 %1200 }
 0x315   : > { %1205 = vst.msk [vmem:[%s2326_s3 + $0x4] sm:$0xf] %vm1191_vm9, %v1201_v15 }
 0x316   : > { %1739 = shalt.err (!%p1736_p11)
}
 0x317   : > { %s1891_s3 = smov 4   ;;  %s2618_s21 = sand.u32 1, %s1846_s10  }
 0x318   : > { %1539 = dma.vmem_to_hbm [thread:$0]  (%p1997_p3), %s2450_s29, 128, %s1255_s18, %s2464_s27, %s2605_s1, %s2605_s1, %s1891_s3  }
 0x319   : > { %s1209_s0 = scalar_lea.sflag [#allocation4], %s2618_s21  ;;  %s1754_s14 = sshra.s32 %s1236_s5, 4  ;;  %s1755_s14 = int_to_ptr.hbm [resolvable:$true] %s1754_s14 }
 0x31a   : > { %s1756_s24 = scalar_lea.hbm %s1755_s14, 8  ;;  %s1760_s22 = scalar_lea.hbm %s2557_s7, 32 }
 0x31b   : > { %p1757_p12 = scmp.ne.s32.totalorder %s1755_s14, %s1756_s24  ;;  %p1761_p1 = scmp.lt.s32.totalorder %s1755_s14, %s2557_s7 }
 0x31c   : > { %p1762_p2 = scmp.lt.s32.totalorder %s1760_s22, %s1756_s24 }
 0x31d   : > { %p1758_p13 = pnand %p1757_p12, %p1997_p3 }
 0x31e   : > { %p1763_p4 = por %p1762_p2, %p1761_p1 }
 0x31f   : > { %p1759_p0 = pneg %p1758_p13 }
 0x321   : > { %p1764_p5 = pnand %p1763_p4, %p1759_p0 }
 0x323   : > { %1767 = shalt.err (!%p1764_p5)
}
 0x324   : > { %1538 = dma.vmem_to_hbm [thread:$0]  (%p1997_p3), %s2456_s4, 128, %s1236_s5, %s1209_s0, %s2605_s1, %s2605_s1, %s1891_s3  }
 0x325   : > { %s1782_s29 = sshra.s32 %s1274_s2, 4  ;;  %s1788_s14 = scalar_lea.hbm %s2559_s9, 32  ;;  %s1783_s29 = int_to_ptr.hbm [resolvable:$true] %s1782_s29 }
 0x326   : > { %s1784_s18 = scalar_lea.hbm %s1783_s29, 8  ;;  %p1789_p10 = scmp.lt.s32.totalorder %s1783_s29, %s2559_s9 }
 0x327   : > { %p1785_p6 = scmp.ne.s32.totalorder %s1783_s29, %s1784_s18  ;;  %p1790_p11 = scmp.lt.s32.totalorder %s1788_s14, %s1784_s18 }
 0x329   : > { %p1786_p7 = pnand %p1785_p6, %p1997_p3  ;;  %p1791_p12 = por %p1790_p11, %p1789_p10 }
 0x32b   : > { %p1787_p9 = pneg %p1786_p7 }
 0x32d   : > { %p1792_p13 = pnand %p1791_p12, %p1787_p9 }
 0x32f   : > { %1795 = shalt.err (!%p1792_p13)
}
 0x330   : > { %1540 = dma.vmem_to_hbm [thread:$0]  (%p1997_p3), %s2462_s17, 128, %s1274_s2, %s2464_s27, %s2605_s1, %s2605_s1, %s1891_s3  }
 0x331 PF: > { %p1560_p0 = scmp.ge.s32.totalorder %s1870_s16, 2  ;;  %s1288_s5 = sand.u32 1, %s1842_s30  }
 0x332   : > { %s1289_s0 = scalar_lea.sflag [#allocation4], %s1288_s5 }
 0x333   : > { %p1549_p1 = pnand %p1560_p0, %p2008_p8 }
 0x335   : > { %p1550_p2 = pneg %p1549_p1 }
 0x337   : > { %1833 = dma.done.wait (%p1550_p2), %s1289_s0, 128  }
 0x338   : > { %1835 = vsyncadd (%p1550_p2), %s1289_s0, 4294967168  ;;  %s2620_s23 = sadd.s32 4294967294, %s1870_s16  }
 0x339   : > { %s1298_s28 = sand.u32 1, %s2620_s23  }
 0x33a   : > { %s1299_s22 = scalar_lea.sflag [#allocation7], %s1298_s28 }
 0x33b   : > { %1837 = dma.done.wait (%p1550_p2), %s1299_s22, 256  }
 0x33c   : > { %1839 = vsyncadd (%p1550_p2), %s1299_s22, 4294967040  ;;  %s27_s16 = sadd.s32 1, %s1870_s16   ;;  %s2621_s12 = sld [smem:[#allocation12_spill]] }
 0x33d   : > { %p24_p3 = scmp.ge.s32.totalorder %s27_s16, 6   ;;  %s2622_s14 = sld [smem:[#allocation13_spill]] }
 0x33e   : > { %s2623_s30 = smov %s1846_s10  ;;  %s2624_s10 = smov %s1850_s11 }
 0x33f   : > { %s2625_s11 = smov %s2026_s19  ;;  %s2626_s13 = smov %s1866_s15 }
 0x340   : > { %s2627_s15 = smov %s2633_s20  ;;  %26 = sbr.rel (!%p24_p3) target bundleno = 15 (0xf), region = 126 }
 0x345   :  { %1315 = vsyncpa [#allocation3], 1 }
 0x346   :  { %1317 = vsyncpa [#allocation3 + $0x1], 1 }
 0x347   :  { %1318 = vsyncpa [#allocation4], 1 }
 0x348   :  { %1320 = vsyncpa [#allocation4 + $0x1], 1 }
 0x349   :  { %1321 = vsyncpa [#allocation7], 1 }
 0x34a   :  { %1323 = vsyncpa [#allocation7 + $0x1], 1 }

</bundles_post_ra>
